<compile_context>
chip_gen: v5e
topology: v5e:2x2
jax: 0.10.0
libtpu: 0.0.40
codegen_flags: <defaults>
</compile_context>

<pallas_src>
import functools

import jax
import jax.numpy as jnp
import numpy as np
from jax.experimental import pallas as pl


# ----------------------------------------------------------------------------
# Single fused kernel: fused 3x MLP -> line_param -> occupancy math, all in VMEM.
# ----------------------------------------------------------------------------
def fused_decoder_kernel(lat_ref, qx_ref, qy_ref, qz_ref, rep_ref,
                         w1_ref, b1_ref, w2_ref, b2_ref, w3_ref, b3_ref,
                         bin_ref, lp_ref, occ_ref, *, H, V, D, C):
    L = H + V + D

    # ---- fused 3-layer MLP: bf16 x bf16 MXU dots, f32 accumulation ----
    x = lat_ref[...]                                                    # (N, 40*hid) bf16
    h = jnp.dot(x, w1_ref[...], preferred_element_type=jnp.float32) + b1_ref[...]
    h = jnp.maximum(h, 0.0).astype(jnp.bfloat16)
    h = jnp.dot(h, w2_ref[...], preferred_element_type=jnp.float32) + b2_ref[...]
    h = jnp.maximum(h, 0.0).astype(jnp.bfloat16)
    m = jnp.dot(h, w3_ref[...], preferred_element_type=jnp.float32) + b3_ref[...]
    # w3/b3 were re-laid-out host-side so that `m` IS the flat (N, 3*L) line_param
    # slab (zero rows included as exact-zero columns) -> write it out directly.
    lp_ref[...] = m                                                     # (N, 3*L)

    # ---- per-room -> per-query row replication via one exact 0/1 matmul ----
    m_rep = jnp.dot(rep_ref[...], m, preferred_element_type=jnp.float32)  # (N*Q, 3*L)

    # non-zero rows of the 3-row line parameterization (flat-layout column slices)
    hor_a = m_rep[:, 0:H]
    d0 = m_rep[:, H + V:L]
    ver_b = m_rep[:, L + H:L + H + V]
    d1 = m_rep[:, L + H + V:2 * L]
    hor_c = m_rep[:, 2 * L:2 * L + H]
    ver_c = m_rep[:, 2 * L + H:2 * L + H + V]
    d2 = m_rep[:, 2 * L + H + V:3 * L]

    # ---- h1 = relu(query . line_param): whole-slab VPU broadcast FMAs (K=3, no MXU) --
    qx = qx_ref[...]                                                    # (N*Q, 1)
    qy = qy_ref[...]
    qz = qz_ref[...]
    h_hor = jnp.maximum(qx * hor_a + qz * hor_c, 0.0)                   # (N*Q, H)
    h_ver = jnp.maximum(qy * ver_b + qz * ver_c, 0.0)                   # (N*Q, V)
    h_dia = jnp.maximum(qx * d0 + qy * d1 + qz * d2, 0.0)               # (N*Q, D)
    h1 = jnp.concatenate([h_hor, h_ver, h_dia], axis=-1)                # (N*Q, L)

    # ---- one matmul against the block-diagonal binary matrix ----
    #   cols [0, C) = axis convex occupancies, cols [C, 2C) = diagonal ones.
    h2 = jnp.dot(h1, bin_ref[...], preferred_element_type=jnp.float32)  # (N*Q, 2C)
    axis_min = jnp.min(h2[:, :C], axis=-1, keepdims=True)
    diag_min = jnp.min(h2[:, C:], axis=-1, keepdims=True)
    pred_min = jnp.minimum(axis_min, diag_min)   # == min over concatenated convex dim

    # packed output slab: [convex_occ | pred | axis | non_axis]
    occ_ref[...] = jnp.concatenate([h2, pred_min, axis_min, diag_min], axis=-1)


# ----------------------------------------------------------------------------
# Host-side parameter fusion (run ONCE, outside jit)
# ----------------------------------------------------------------------------
def _block_diag(*mats):
    rows = sum(m.shape[0] for m in mats)
    cols = sum(m.shape[1] for m in mats)
    out = jnp.zeros((rows, cols), mats[0].dtype)
    r = c = 0
    for m in mats:
        out = out.at[r:r + m.shape[0], c:c + m.shape[1]].set(m)
        r += m.shape[0]
        c += m.shape[1]
    return out


def fuse_decoder_params(params, cfg):
    """Pack the 3 MLPs + binary matrix into the kernel's fused operands (bf16 weights)."""
    (w1h, b1h), (w2h, b2h), (w3h, b3h) = params["horizontal_mlp"]
    (w1v, b1v), (w2v, b2v), (w3v, b3v) = params["vertical_mlp"]
    (w1d, b1d), (w2d, b2d), (w3d, b3d) = params["diagonal_mlp"]
    H = cfg["num_horizontal_line"]
    V = cfg["num_vertical_line"]
    D = cfg["num_diagnoal_line"]
    L = H + V + D
    hid = 2 * cfg["hidden_dim"]
    B = params["binary_matrix"]

    # Layer-3 re-layout so the fused MLP output is directly the flat (3, L) line_param:
    #   row0 = [hor_a, 0, d0], row1 = [0, ver_b, d1], row2 = [hor_c, ver_c, d2]
    w3 = jnp.zeros((3 * hid, 3 * L), jnp.float32)
    b3 = jnp.zeros((1, 3 * L), jnp.float32)
    # horizontal block (hidden rows 0:hid)
    w3 = w3.at[0:hid, 0:H].set(w3h[:, :H])
    w3 = w3.at[0:hid, 2 * L:2 * L + H].set(w3h[:, H:])
    b3 = b3.at[:, 0:H].set(b3h[:, :H])
    b3 = b3.at[:, 2 * L:2 * L + H].set(b3h[:, H:])
    # vertical block (hidden rows hid:2hid)
    w3 = w3.at[hid:2 * hid, L + H:L + H + V].set(w3v[:, :V])
    w3 = w3.at[hid:2 * hid, 2 * L + H:2 * L + H + V].set(w3v[:, V:])
    b3 = b3.at[:, L + H:L + H + V].set(b3v[:, :V])
    b3 = b3.at[:, 2 * L + H:2 * L + H + V].set(b3v[:, V:])
    # diagonal block (hidden rows 2hid:3hid)
    w3 = w3.at[2 * hid:, H + V:L].set(w3d[:, :D])
    w3 = w3.at[2 * hid:, L + H + V:2 * L].set(w3d[:, D:2 * D])
    w3 = w3.at[2 * hid:, 2 * L + H + V:].set(w3d[:, 2 * D:])
    b3 = b3.at[:, H + V:L].set(b3d[:, :D])
    b3 = b3.at[:, L + H + V:2 * L].set(b3d[:, D:2 * D])
    b3 = b3.at[:, 2 * L + H + V:].set(b3d[:, 2 * D:])

    # TODO(synk): optional int8 (v5e/v6e) or fp8 (v7x) quantization of w1 for ~4x DMA cut.
    return dict(
        w1=jnp.concatenate([w1h, w1v, w1d], axis=1).astype(jnp.bfloat16),  # (40*hid, 3*hid)
        b1=jnp.concatenate([b1h, b1v, b1d], axis=1),            # biases stay f32 (tiny)
        w2=_block_diag(w2h, w2v, w2d).astype(jnp.bfloat16),     # block-diagonal hidden
        b2=jnp.concatenate([b2h, b2v, b2d], axis=1),
        w3=w3.astype(jnp.bfloat16),                             # (3*hid, 3*L) line_param layout
        b3=b3,
        bin_bd=_block_diag(B[:H + V], B[H + V:]),               # (L, 2C), f32
    )


# ----------------------------------------------------------------------------
# Forward pass (phase == 2)
# ----------------------------------------------------------------------------
def room_wise_decoder_forward(params, room_latent, query, cfg, fused=None):
    bs, num_room, nq_per_room, hidden_dim = room_latent.shape
    num_query = query.shape[2]
    H = cfg["num_horizontal_line"]
    V = cfg["num_vertical_line"]
    D = cfg["num_diagnoal_line"]
    C = cfg["num_convex"]
    L = H + V + D

    N = bs * num_room
    NQ = N * num_query

    if fused is None:  # prefer passing pre-fused params (fused once, outside jit)
        fused = fuse_decoder_params(params, cfg)

    lat_flat = room_latent.reshape(N, nq_per_room * hidden_dim).astype(jnp.bfloat16)

    # lane-dense query columns: three (N*Q, 1) f32 arrays (no padded last-dim-3 tile,
    # no per-component slicing inside the kernel).
    qf = query.reshape(NQ, 3).astype(jnp.float32)
    qx, qy, qz = qf[:, 0:1], qf[:, 1:2], qf[:, 2:3]

    # constant per-room -> per-query row-repeat matrix (compile-time constant under jit)
    rep = jnp.asarray(np.repeat(np.eye(N, dtype=np.float32), num_query, axis=0))

    kernel = functools.partial(fused_decoder_kernel, H=H, V=V, D=D, C=C)
    lp_flat, occ = pl.pallas_call(
        kernel,
        out_shape=(
            jax.ShapeDtypeStruct((N, 3 * L), jnp.float32),        # flat line_param
            jax.ShapeDtypeStruct((NQ, 2 * C + 3), jnp.float32),   # packed occupancies
        ),
    )(lat_flat, qx, qy, qz, rep,
      fused["w1"], fused["b1"], fused["w2"], fused["b2"],
      fused["w3"], fused["b3"], fused["bin_bd"])

    # --- wrapper is reshape-only glue now ---
    line_param = lp_flat.reshape(bs, num_room, 3, L)
    convex_occ = occ[:, :2 * C].reshape(bs, num_room, num_query, 2 * C)
    pred_occ = occ[:, 2 * C:2 * C + 1].reshape(bs, num_room, num_query, 1)
    axis_occ = occ[:, 2 * C + 1:2 * C + 2].reshape(bs, num_room, num_query, 1)
    non_axis_occ = occ[:, 2 * C + 2:2 * C + 3].reshape(bs, num_room, num_query, 1)

    return {
        "line_param": line_param,
        "convex_occ": convex_occ,
        "pred_occ": pred_occ,
        "axis_occ": axis_occ,
        "non_axis_occ": non_axis_occ,
        "binary_weights": params["binary_matrix"],
        "merge_weights": params["merge_matrix"],
    }


# ----------------------------------------------------------------------------
# Parameter construction (deterministic, synthetic)
# ----------------------------------------------------------------------------
def init_mlp_params(key, in_dim, hid_dim, out_dim):
    ks = jax.random.split(key, 6)
    w1 = jax.random.normal(ks[0], (in_dim, hid_dim), jnp.float32) * 0.02
    b1 = jax.random.normal(ks[1], (1, hid_dim), jnp.float32) * 0.02
    w2 = jax.random.normal(ks[2], (hid_dim, hid_dim), jnp.float32) * 0.02
    b2 = jax.random.normal(ks[3], (1, hid_dim), jnp.float32) * 0.02
    w3 = jax.random.normal(ks[4], (hid_dim, out_dim), jnp.float32) * 0.02
    b3 = jax.random.normal(ks[5], (1, out_dim), jnp.float32) * 0.02
    return ((w1, b1), (w2, b2), (w3, b3))


def init_decoder_params(key, cfg):
    kh, kv, kd, kb, km = jax.random.split(key, 5)
    in_dim = cfg["hidden_dim"] * 40
    hid = cfg["hidden_dim"] * 2
    H, V, D, C = (cfg["num_horizontal_line"], cfg["num_vertical_line"],
                  cfg["num_diagnoal_line"], cfg["num_convex"])
    return {
        "horizontal_mlp": init_mlp_params(kh, in_dim, hid, H * 2),
        "vertical_mlp": init_mlp_params(kv, in_dim, hid, V * 2),
        "diagonal_mlp": init_mlp_params(kd, in_dim, hid, D * 3),
        "binary_matrix": jax.random.normal(kb, (H + V + D, C), jnp.float32) * 0.02,
        "merge_matrix": 1e-5 + jax.random.normal(km, (2 * C, 1), jnp.float32) * 0.02,
    }


# ----------------------------------------------------------------------------
# Pure-JAX f32 reference (correctness check only)
# ----------------------------------------------------------------------------
def mlp3_ref(x, p):
    (w1, b1), (w2, b2), (w3, b3) = p
    h = jnp.maximum(x @ w1 + b1, 0.0)
    h = jnp.maximum(h @ w2 + b2, 0.0)
    return h @ w3 + b3


def ref_forward(params, room_latent, query, cfg):
    bs, num_room, nqpr, hd = room_latent.shape
    num_query = query.shape[2]
    H, V, D, C = (cfg["num_horizontal_line"], cfg["num_vertical_line"],
                  cfg["num_diagnoal_line"], cfg["num_convex"])
    N = bs * num_room
    lat = room_latent.reshape(N, nqpr * hd)
    q = query.reshape(N, num_query, 3)
    hor_ = mlp3_ref(lat, params["horizontal_mlp"]).reshape(N, 2, H)
    ver_ = mlp3_ref(lat, params["vertical_mlp"]).reshape(N, 2, V)
    dia = mlp3_ref(lat, params["diagonal_mlp"]).reshape(N, 3, D)
    hp = jnp.concatenate([hor_[:, :1], jnp.zeros((N, 1, H)), hor_[:, 1:]], axis=1)
    vp = jnp.concatenate([jnp.zeros((N, 1, V)), ver_[:, :1], ver_[:, 1:]], axis=1)
    lp = jnp.concatenate([hp, vp, dia], axis=2)
    B = params["binary_matrix"]
    h1 = jnp.maximum(jnp.einsum("nqk,nkl->nql", q, lp[:, :, :H + V]), 0.0)
    h2 = jnp.einsum("nql,lc->nqc", h1, B[:H + V])
    ah3 = jnp.min(h2, axis=2, keepdims=True)
    d1 = jnp.maximum(jnp.einsum("nqk,nkl->nql", q, lp[:, :, H + V:]), 0.0)
    d2 = jnp.einsum("nql,lc->nqc", d1, B[H + V:])
    dh3 = jnp.min(d2, axis=2, keepdims=True)
    h2c = jnp.concatenate([h2, d2], axis=2)
    h3 = jnp.min(h2c, axis=2, keepdims=True)
    return {
        "line_param": lp.reshape(bs, num_room, 3, H + V + D),
        "convex_occ": h2c.reshape(bs, num_room, num_query, -1),
        "pred_occ": h3.reshape(bs, num_room, num_query, 1),
        "axis_occ": ah3.reshape(bs, num_room, num_query, 1),
        "non_axis_occ": dh3.reshape(bs, num_room, num_query, 1),
    }


# ----------------------------------------------------------------------------
if __name__ == "__main__":
    cfg = dict(
        phase=2,
        hidden_dim=32,
        num_convex=8,
        num_horizontal_line=8,
        num_vertical_line=8,
        num_diagnoal_line=8,
    )
    num_line = cfg["num_horizontal_line"] + cfg["num_vertical_line"] + cfg["num_diagnoal_line"]

    bs, num_room, num_query_per_room, num_query = 2, 4, 40, 16

    key = jax.random.PRNGKey(0)
    kp, kl, kq = jax.random.split(key, 3)
    params = init_decoder_params(kp, cfg)
    room_latent = jax.random.normal(
        kl, (bs, num_room, num_query_per_room, cfg["hidden_dim"]), jnp.float32)
    query = jax.random.normal(kq, (bs, num_room, num_query, 3), jnp.float32)

    # Fuse / bf16-cast the weights once, outside jit (no per-call weight repacking).
    fused = fuse_decoder_params(params, cfg)

    fwd = jax.jit(lambda p, f, rl, q: room_wise_decoder_forward(p, rl, q, cfg, fused=f))
    outputs = fwd(params, fused, room_latent, query)
    jax.block_until_ready(outputs)

    ref = ref_forward(params, room_latent, query, cfg)
    # Tolerance relaxed (vs 1e-4) because MLP weights/activations are bf16 in-kernel.
    for name in ["line_param", "convex_occ", "pred_occ", "axis_occ", "non_axis_occ"]:
        np.testing.assert_allclose(
            np.asarray(outputs[name]), np.asarray(ref[name]), rtol=5e-2, atol=5e-3)

    assert outputs["line_param"].shape == (bs, num_room, 3, num_line)
    assert outputs["convex_occ"].shape == (bs, num_room, num_query, 2 * cfg["num_convex"])
    assert outputs["pred_occ"].shape == (bs, num_room, num_query, 1)
    assert outputs["axis_occ"].shape == (bs, num_room, num_query, 1)
    assert outputs["non_axis_occ"].shape == (bs, num_room, num_query, 1)

    print("KERNEL_OK")
</pallas_src>

<mosaic_0001>
module attributes {stable_mosaic.version = 11 : i64} {
  func.func @fused_decoder_kernel(%arg0: memref<8x1280xbf16, #tpu.memory_space<vmem>>, %arg1: memref<128x1xf32, #tpu.memory_space<vmem>>, %arg2: memref<128x1xf32, #tpu.memory_space<vmem>>, %arg3: memref<128x1xf32, #tpu.memory_space<vmem>>, %arg4: memref<128x8xf32, #tpu.memory_space<vmem>>, %arg5: memref<1280x192xbf16, #tpu.memory_space<vmem>>, %arg6: memref<1x192xf32, #tpu.memory_space<vmem>>, %arg7: memref<192x192xbf16, #tpu.memory_space<vmem>>, %arg8: memref<1x192xf32, #tpu.memory_space<vmem>>, %arg9: memref<192x72xbf16, #tpu.memory_space<vmem>>, %arg10: memref<1x72xf32, #tpu.memory_space<vmem>>, %arg11: memref<24x16xf32, #tpu.memory_space<vmem>>, %arg12: memref<8x72xf32, #tpu.memory_space<vmem>>, %arg13: memref<128x19xf32, #tpu.memory_space<vmem>>) attributes {dimension_semantics = [], scalar_prefetch = 0 : i64, scratch_operands = 0 : i64, tpu.core_type = #tpu.core_type<tc>} {
    %c0 = arith.constant 0 : index
    %c0_0 = arith.constant 0 : index
    %0 = vector.load %arg0[%c0, %c0_0] : memref<8x1280xbf16, #tpu.memory_space<vmem>>, vector<8x1280xbf16>
    %c0_1 = arith.constant 0 : index
    %c0_2 = arith.constant 0 : index
    %1 = vector.load %arg5[%c0_1, %c0_2] : memref<1280x192xbf16, #tpu.memory_space<vmem>>, vector<1280x192xbf16>
    %cst = arith.constant dense<0.000000e+00> : vector<8x192xf32>
    %2 = tpu.matmul %0, %1, %cst {dimension_numbers = #tpu.dot_dimension_numbers<[1], [0], [0], [1], [0, 0, 1, 1], [], []>} : vector<8x1280xbf16>, vector<1280x192xbf16>, vector<8x192xf32> -> vector<8x192xf32>
    %c0_3 = arith.constant 0 : index
    %c0_4 = arith.constant 0 : index
    %3 = vector.load %arg6[%c0_3, %c0_4] : memref<1x192xf32, #tpu.memory_space<vmem>>, vector<1x192xf32>
    %4 = vector.broadcast %3 : vector<1x192xf32> to vector<8x192xf32>
    %5 = arith.addf %2, %4 : vector<8x192xf32>
    %cst_5 = arith.constant 0.000000e+00 : f32
    %6 = vector.broadcast %cst_5 : f32 to vector<8x192xf32>
    %7 = arith.maximumf %5, %6 : vector<8x192xf32>
    %8 = arith.truncf %7 : vector<8x192xf32> to vector<8x192xbf16>
    %c0_6 = arith.constant 0 : index
    %c0_7 = arith.constant 0 : index
    %9 = vector.load %arg7[%c0_6, %c0_7] : memref<192x192xbf16, #tpu.memory_space<vmem>>, vector<192x192xbf16>
    %cst_8 = arith.constant dense<0.000000e+00> : vector<8x192xf32>
    %10 = tpu.matmul %8, %9, %cst_8 {dimension_numbers = #tpu.dot_dimension_numbers<[1], [0], [0], [1], [0, 0, 1, 1], [], []>} : vector<8x192xbf16>, vector<192x192xbf16>, vector<8x192xf32> -> vector<8x192xf32>
    %c0_9 = arith.constant 0 : index
    %c0_10 = arith.constant 0 : index
    %11 = vector.load %arg8[%c0_9, %c0_10] : memref<1x192xf32, #tpu.memory_space<vmem>>, vector<1x192xf32>
    %12 = vector.broadcast %11 : vector<1x192xf32> to vector<8x192xf32>
    %13 = arith.addf %10, %12 : vector<8x192xf32>
    %cst_11 = arith.constant 0.000000e+00 : f32
    %14 = vector.broadcast %cst_11 : f32 to vector<8x192xf32>
    %15 = arith.maximumf %13, %14 : vector<8x192xf32>
    %16 = arith.truncf %15 : vector<8x192xf32> to vector<8x192xbf16>
    %c0_12 = arith.constant 0 : index
    %c0_13 = arith.constant 0 : index
    %17 = vector.load %arg9[%c0_12, %c0_13] : memref<192x72xbf16, #tpu.memory_space<vmem>>, vector<192x72xbf16>
    %cst_14 = arith.constant dense<0.000000e+00> : vector<8x72xf32>
    %18 = tpu.matmul %16, %17, %cst_14 {dimension_numbers = #tpu.dot_dimension_numbers<[1], [0], [0], [1], [0, 0, 1, 1], [], []>} : vector<8x192xbf16>, vector<192x72xbf16>, vector<8x72xf32> -> vector<8x72xf32>
    %c0_15 = arith.constant 0 : index
    %c0_16 = arith.constant 0 : index
    %19 = vector.load %arg10[%c0_15, %c0_16] : memref<1x72xf32, #tpu.memory_space<vmem>>, vector<1x72xf32>
    %20 = vector.broadcast %19 : vector<1x72xf32> to vector<8x72xf32>
    %21 = arith.addf %18, %20 : vector<8x72xf32>
    %c0_17 = arith.constant 0 : index
    %c0_18 = arith.constant 0 : index
    %22 = vector.load %arg12[%c0_17, %c0_18] : memref<8x72xf32, #tpu.memory_space<vmem>>, vector<8x72xf32>
    tpu.vector_store %arg12[%c0_17, %c0_18], %21 {strides = array<i32>} : memref<8x72xf32, #tpu.memory_space<vmem>>, vector<8x72xf32>,
    %c0_19 = arith.constant 0 : index
    %c0_20 = arith.constant 0 : index
    %23 = vector.load %arg4[%c0_19, %c0_20] : memref<128x8xf32, #tpu.memory_space<vmem>>, vector<128x8xf32>
    %cst_21 = arith.constant dense<0.000000e+00> : vector<128x72xf32>
    %24 = tpu.matmul %23, %21, %cst_21 {dimension_numbers = #tpu.dot_dimension_numbers<[1], [0], [0], [1], [0, 0, 1, 1], [], []>} : vector<128x8xf32>, vector<8x72xf32>, vector<128x72xf32> -> vector<128x72xf32>
    %25 = vector.extract_strided_slice %24 {offsets = [0, 0], sizes = [128, 8], strides = [1, 1]} : vector<128x72xf32> to vector<128x8xf32>
    %26 = vector.extract_strided_slice %24 {offsets = [0, 16], sizes = [128, 8], strides = [1, 1]} : vector<128x72xf32> to vector<128x8xf32>
    %27 = vector.extract_strided_slice %24 {offsets = [0, 32], sizes = [128, 8], strides = [1, 1]} : vector<128x72xf32> to vector<128x8xf32>
    %28 = vector.extract_strided_slice %24 {offsets = [0, 40], sizes = [128, 8], strides = [1, 1]} : vector<128x72xf32> to vector<128x8xf32>
    %29 = vector.extract_strided_slice %24 {offsets = [0, 48], sizes = [128, 8], strides = [1, 1]} : vector<128x72xf32> to vector<128x8xf32>
    %30 = vector.extract_strided_slice %24 {offsets = [0, 56], sizes = [128, 8], strides = [1, 1]} : vector<128x72xf32> to vector<128x8xf32>
    %31 = vector.extract_strided_slice %24 {offsets = [0, 64], sizes = [128, 8], strides = [1, 1]} : vector<128x72xf32> to vector<128x8xf32>
    %c0_22 = arith.constant 0 : index
    %c0_23 = arith.constant 0 : index
    %32 = vector.load %arg1[%c0_22, %c0_23] : memref<128x1xf32, #tpu.memory_space<vmem>>, vector<128x1xf32>
    %c0_24 = arith.constant 0 : index
    %c0_25 = arith.constant 0 : index
    %33 = vector.load %arg2[%c0_24, %c0_25] : memref<128x1xf32, #tpu.memory_space<vmem>>, vector<128x1xf32>
    %c0_26 = arith.constant 0 : index
    %c0_27 = arith.constant 0 : index
    %34 = vector.load %arg3[%c0_26, %c0_27] : memref<128x1xf32, #tpu.memory_space<vmem>>, vector<128x1xf32>
    %35 = vector.broadcast %32 : vector<128x1xf32> to vector<128x8xf32>
    %36 = arith.mulf %35, %25 : vector<128x8xf32>
    %37 = vector.broadcast %34 : vector<128x1xf32> to vector<128x8xf32>
    %38 = arith.mulf %37, %29 : vector<128x8xf32>
    %39 = arith.addf %36, %38 : vector<128x8xf32>
    %cst_28 = arith.constant 0.000000e+00 : f32
    %40 = vector.broadcast %cst_28 : f32 to vector<128x8xf32>
    %41 = arith.maximumf %39, %40 : vector<128x8xf32>
    %42 = vector.broadcast %33 : vector<128x1xf32> to vector<128x8xf32>
    %43 = arith.mulf %42, %27 : vector<128x8xf32>
    %44 = vector.broadcast %34 : vector<128x1xf32> to vector<128x8xf32>
    %45 = arith.mulf %44, %30 : vector<128x8xf32>
    %46 = arith.addf %43, %45 : vector<128x8xf32>
    %cst_29 = arith.constant 0.000000e+00 : f32
    %47 = vector.broadcast %cst_29 : f32 to vector<128x8xf32>
    %48 = arith.maximumf %46, %47 : vector<128x8xf32>
    %49 = vector.broadcast %32 : vector<128x1xf32> to vector<128x8xf32>
    %50 = arith.mulf %49, %26 : vector<128x8xf32>
    %51 = vector.broadcast %33 : vector<128x1xf32> to vector<128x8xf32>
    %52 = arith.mulf %51, %28 : vector<128x8xf32>
    %53 = arith.addf %50, %52 : vector<128x8xf32>
    %54 = vector.broadcast %34 : vector<128x1xf32> to vector<128x8xf32>
    %55 = arith.mulf %54, %31 : vector<128x8xf32>
    %56 = arith.addf %53, %55 : vector<128x8xf32>
    %cst_30 = arith.constant 0.000000e+00 : f32
    %57 = vector.broadcast %cst_30 : f32 to vector<128x8xf32>
    %58 = arith.maximumf %56, %57 : vector<128x8xf32>
    %59 = tpu.concatenate %41, %48, %58 in 1 : vector<128x8xf32>, vector<128x8xf32>, vector<128x8xf32> -> vector<128x24xf32>
    %c0_31 = arith.constant 0 : index
    %c0_32 = arith.constant 0 : index
    %60 = vector.load %arg11[%c0_31, %c0_32] : memref<24x16xf32, #tpu.memory_space<vmem>>, vector<24x16xf32>
    %cst_33 = arith.constant dense<0.000000e+00> : vector<128x16xf32>
    %61 = tpu.matmul %59, %60, %cst_33 {dimension_numbers = #tpu.dot_dimension_numbers<[1], [0], [0], [1], [0, 0, 1, 1], [], []>} : vector<128x24xf32>, vector<24x16xf32>, vector<128x16xf32> -> vector<128x16xf32>
    %62 = vector.extract_strided_slice %61 {offsets = [0, 0], sizes = [128, 8], strides = [1, 1]} : vector<128x16xf32> to vector<128x8xf32>
    %cst_34 = arith.constant dense<0x7F800000> : vector<128xf32>
    %63 = vector.multi_reduction <minimumf>, %62, %cst_34 [1] : vector<128x8xf32> to vector<128xf32>
    %64 = vector.shape_cast %63 : vector<128xf32> to vector<128x1xf32>
    %65 = vector.extract_strided_slice %61 {offsets = [0, 8], sizes = [128, 8], strides = [1, 1]} : vector<128x16xf32> to vector<128x8xf32>
    %cst_35 = arith.constant dense<0x7F800000> : vector<128xf32>
    %66 = vector.multi_reduction <minimumf>, %65, %cst_35 [1] : vector<128x8xf32> to vector<128xf32>
    %67 = vector.shape_cast %66 : vector<128xf32> to vector<128x1xf32>
    %68 = arith.minimumf %64, %67 : vector<128x1xf32>
    %69 = tpu.concatenate %61, %68, %64, %67 in 1 : vector<128x16xf32>, vector<128x1xf32>, vector<128x1xf32>, vector<128x1xf32> -> vector<128x19xf32>
    %c0_36 = arith.constant 0 : index
    %c0_37 = arith.constant 0 : index
    %70 = vector.load %arg13[%c0_36, %c0_37] : memref<128x19xf32, #tpu.memory_space<vmem>>, vector<128x19xf32>
    tpu.vector_store %arg13[%c0_36, %c0_37], %69 {strides = array<i32>} : memref<128x19xf32, #tpu.memory_space<vmem>>, vector<128x19xf32>,
    return
  }
}

</mosaic_0001>

<bundles_post_ra>
// kernel: _lambda_.1
= control target key start
LH: loop header
LB: loop body
LE: loop exit
PB: predicated region body
PF: predicated region fallthrough
CT: control target
= control target key end

     0   :  { %vm1464_vm0 = vcmask 523264   ;;  %vm1653_vm1 = vcmask 588800   ;;  %vm1671_vm2 = vcmask 64512   ;;  %s3839_s17 = smov 80   ;;  %vm2489_vm3 = vcmask 130048   ;;  %s5902_s5 = inlined_call_operand.vmem [shape: bf16[1280,192], index: 5, kind: input, shape index: {}]   ;;  %s5903_s0 = inlined_call_operand.vmem [shape: bf16[8,1280], index: 0, kind: input, shape index: {}]   ;;  %s5904_s7 = inlined_call_operand.vmem [shape: bf16[192,192], index: 7, kind: input, shape index: {}]   ;;  %s5905_s6 = inlined_call_operand.vmem [shape: f32[1,192], index: 6, kind: input, shape index: {}]   ;;  %s5906_s9 = inlined_call_operand.vmem [shape: bf16[192,72], index: 9, kind: input, shape index: {}]   ;;  %s5907_s1 = inlined_call_operand.vmem [shape: f32[128,1], index: 1, kind: input, shape index: {}]   ;;  %s5908_s10 = inlined_call_operand.vmem [shape: f32[1,72], index: 10, kind: input, shape index: {}]   ;;  %s5909_s8 = inlined_call_operand.vmem [shape: f32[1,192], index: 8, kind: input, shape index: {}]   ;;  %s5910_s3 = inlined_call_operand.vmem [shape: f32[128,1], index: 3, kind: input, shape index: {}]   ;;  %s5911_s2 = inlined_call_operand.vmem [shape: f32[128,1], index: 2, kind: input, shape index: {}]   ;;  %s5912_s4 = inlined_call_operand.vmem [shape: f32[128,8], index: 4, kind: input, shape index: {}]   ;;  %s5913_s12 = inlined_call_operand.vmem [shape: f32[8,72], index: 12, kind: output, shape index: {0}]   ;;  %s5914_s11 = inlined_call_operand.vmem [shape: f32[24,16], index: 11, kind: input, shape index: {}]   ;;  %s5915_s13 = inlined_call_operand.vmem [shape: f32[128,19], index: 13, kind: output, shape index: {1}]  }
   0x1   :  { %v2869_v0 = vld [vmem:[%s5902_s5 + $0x70] sm:$0xf]  ;;  %v3645_v1 = vld [vmem:[%s5902_s5 + $0x74] sm:$0xf0]  ;;  %v2861_v11 = vld [vmem:[%s5902_s5 + $0x60] sm:$0xf] }
   0x2   :  { %v2933_v2 = vld [vmem:[%s5902_s5 + $0xf0] sm:$0xf]  ;;  %v2870_v3 = vor.u32 %v3645_v1, %v2869_v0  ;;  %v3661_v4 = vld [vmem:[%s5902_s5 + $0xf4] sm:$0xf0]  ;;  %v3643_v13 = vld [vmem:[%s5902_s5 + $0x64] sm:$0xf0] }
   0x3   :  { %v2997_v5 = vld [vmem:[%s5902_s5 + $0x170] sm:$0xf]  ;;  %v3677_v6 = vld [vmem:[%s5902_s5 + $0x174] sm:$0xf0]  ;;  %v2934_v7 = vor.u32 %v3661_v4, %v2933_v2  ;;  %v2925_v14 = vld [vmem:[%s5902_s5 + $0xe0] sm:$0xf]  ;;  %v2862_v16 = vor.u32 %v3643_v13, %v2861_v11 }
   0x4   :  { %v2998_v8 = vor.u32 %v3677_v6, %v2997_v5  ;;  %v3061_v9 = vld [vmem:[%s5902_s5 + $0x1f0] sm:$0xf]  ;;  %v3693_v10 = vld [vmem:[%s5902_s5 + $0x1f4] sm:$0xf0]  ;;  %1050 = vmatpush.bf16.msra.mxu0 %v2870_v3  ;;  %v3659_v15 = vld [vmem:[%s5902_s5 + $0xe4] sm:$0xf0] }
   0x5   :  { %v3062_v12 = vor.u32 %v3693_v10, %v3061_v9  ;;  %1063 = vmatpush.bf16.msra.mxu1 %v2934_v7  ;;  %v2926_v17 = vor.u32 %v3659_v15, %v2925_v14  ;;  %v2989_v18 = vld [vmem:[%s5902_s5 + $0x160] sm:$0xf]  ;;  %v3675_v19 = vld [vmem:[%s5902_s5 + $0x164] sm:$0xf0]  ;;  %v2853_v23 = vld [vmem:[%s5902_s5 + $0x50] sm:$0xf] }
   0x6   :  { %1076 = vmatpush.bf16.msra.mxu2 %v2998_v8  ;;  %v3053_v20 = vld [vmem:[%s5902_s5 + $0x1e0] sm:$0xf]  ;;  %v2990_v21 = vor.u32 %v3675_v19, %v2989_v18  ;;  %v3691_v22 = vld [vmem:[%s5902_s5 + $0x1e4] sm:$0xf0]  ;;  %v3641_v24 = vld [vmem:[%s5902_s5 + $0x54] sm:$0xf0] }
   0x7   :  { %1089 = vmatpush.bf16.msra.mxu3 %v3062_v12  ;;  %v3054_v25 = vor.u32 %v3691_v22, %v3053_v20  ;;  %v2917_v26 = vld [vmem:[%s5902_s5 + $0xd0] sm:$0xf]  ;;  %v3657_v27 = vld [vmem:[%s5902_s5 + $0xd4] sm:$0xf0]  ;;  %v2854_v29 = vor.u32 %v3641_v24, %v2853_v23  ;;  %v2845_v35 = vld [vmem:[%s5902_s5 + $0x40] sm:$0xf] }
   0x8   :  { %v2981_v28 = vld [vmem:[%s5902_s5 + $0x150] sm:$0xf]  ;;  %1051 = vmatpush.bf16.msra.mxu0 %v2862_v16  ;;  %v3673_v30 = vld [vmem:[%s5902_s5 + $0x154] sm:$0xf0]  ;;  %v2918_v33 = vor.u32 %v3657_v27, %v2917_v26  ;;  %v3639_v36 = vld [vmem:[%s5902_s5 + $0x44] sm:$0xf0] }
   0x9   :  { %v3045_v31 = vld [vmem:[%s5902_s5 + $0x1d0] sm:$0xf]  ;;  %v3689_v32 = vld [vmem:[%s5902_s5 + $0x1d4] sm:$0xf0]  ;;  %1064 = vmatpush.bf16.msra.mxu1 %v2926_v17  ;;  %v2982_v34 = vor.u32 %v3673_v30, %v2981_v28  ;;  %v2909_v37 = vld [vmem:[%s5902_s5 + $0xc0] sm:$0xf]  ;;  %v2846_v44 = vor.u32 %v3639_v36, %v2845_v35 }
   0xa   :  { %1077 = vmatpush.bf16.msra.mxu2 %v2990_v21  ;;  %v3046_v38 = vor.u32 %v3689_v32, %v3045_v31  ;;  %v3655_v39 = vld [vmem:[%s5902_s5 + $0xc4] sm:$0xf0]  ;;  %v2973_v40 = vld [vmem:[%s5902_s5 + $0x140] sm:$0xf]  ;;  %v2837_v47 = vld [vmem:[%s5902_s5 + $0x30] sm:$0xf] }
   0xb   :  { %1090 = vmatpush.bf16.msra.mxu3 %v3054_v25  ;;  %v3671_v41 = vld [vmem:[%s5902_s5 + $0x144] sm:$0xf0]  ;;  %v3037_v42 = vld [vmem:[%s5902_s5 + $0x1c0] sm:$0xf]  ;;  %v2910_v45 = vor.u32 %v3655_v39, %v2909_v37  ;;  %v3637_v48 = vld [vmem:[%s5902_s5 + $0x34] sm:$0xf0] }
   0xc   :  { %v3687_v43 = vld [vmem:[%s5902_s5 + $0x1c4] sm:$0xf0]  ;;  %1052 = vmatpush.bf16.msra.mxu0 %v2854_v29  ;;  %v2974_v46 = vor.u32 %v3671_v41, %v2973_v40  ;;  %v2901_v49 = vld [vmem:[%s5902_s5 + $0xb0] sm:$0xf]  ;;  %v3653_v51 = vld [vmem:[%s5902_s5 + $0xb4] sm:$0xf0]  ;;  %v2838_v56 = vor.u32 %v3637_v48, %v2837_v47 }
   0xd   :  { %1065 = vmatpush.bf16.msra.mxu1 %v2918_v33  ;;  %v3038_v50 = vor.u32 %v3687_v43, %v3037_v42  ;;  %v2965_v52 = vld [vmem:[%s5902_s5 + $0x130] sm:$0xf]  ;;  %v3669_v53 = vld [vmem:[%s5902_s5 + $0x134] sm:$0xf0]  ;;  %v2902_v57 = vor.u32 %v3653_v51, %v2901_v49  ;;  %v2829_v59 = vld [vmem:[%s5902_s5 + $0x20] sm:$0xf] }
   0xe   :  { %1078 = vmatpush.bf16.msra.mxu2 %v2982_v34  ;;  %v3029_v54 = vld [vmem:[%s5902_s5 + $0x1b0] sm:$0xf]  ;;  %v3685_v55 = vld [vmem:[%s5902_s5 + $0x1b4] sm:$0xf0]  ;;  %v2966_v58 = vor.u32 %v3669_v53, %v2965_v52  ;;  %v3635_v60 = vld [vmem:[%s5902_s5 + $0x24] sm:$0xf0] }
   0xf   :  { %1091 = vmatpush.bf16.msra.mxu3 %v3046_v38  ;;  %v2893_v61 = vld [vmem:[%s5902_s5 + $0xa0] sm:$0xf]  ;;  %v3030_v62 = vor.u32 %v3685_v55, %v3029_v54  ;;  %v3651_v63 = vld [vmem:[%s5902_s5 + $0xa4] sm:$0xf0]  ;;  %v2830_v4 = vor.u32 %v3635_v60, %v2829_v59  ;;  %v2821_v7 = vld [vmem:[%s5902_s5 + $0x10] sm:$0xf] }
  0x10   :  { %1053 = vmatpush.bf16.msra.mxu0 %v2846_v44  ;;  %v2957_v0 = vld [vmem:[%s5902_s5 + $0x120] sm:$0xf]  ;;  %v3667_v1 = vld [vmem:[%s5902_s5 + $0x124] sm:$0xf0]  ;;  %v2894_v5 = vor.u32 %v3651_v63, %v2893_v61  ;;  %v3633_v8 = vld [vmem:[%s5902_s5 + $0x14] sm:$0xf0] }
  0x11   :  { %1066 = vmatpush.bf16.msra.mxu1 %v2910_v45  ;;  %v3021_v2 = vld [vmem:[%s5902_s5 + $0x1a0] sm:$0xf]  ;;  %v3683_v3 = vld [vmem:[%s5902_s5 + $0x1a4] sm:$0xf0]  ;;  %v2958_v6 = vor.u32 %v3667_v1, %v2957_v0  ;;  %v2885_v9 = vld [vmem:[%s5902_s5 + $0x90] sm:$0xf]  ;;  %v2822_v16 = vor.u32 %v3633_v8, %v2821_v7 }
  0x12   :  { %1079 = vmatpush.bf16.msra.mxu2 %v2974_v46  ;;  %v3022_v10 = vor.u32 %v3683_v3, %v3021_v2  ;;  %v3649_v11 = vld [vmem:[%s5902_s5 + $0x94] sm:$0xf0]  ;;  %v2949_v12 = vld [vmem:[%s5902_s5 + $0x110] sm:$0xf]  ;;  %v2813_v17 = vld [vmem:[%s5902_s5] sm:$0xf] }
  0x13   :  { %1092 = vmatpush.bf16.msra.mxu3 %v3038_v50  ;;  %v3665_v13 = vld [vmem:[%s5902_s5 + $0x114] sm:$0xf0]  ;;  %v3013_v14 = vld [vmem:[%s5902_s5 + $0x190] sm:$0xf]  ;;  %v3631_v18 = vld [vmem:[%s5902_s5 + $0x4] sm:$0xf0]  ;;  %v2886_v19 = vor.u32 %v3649_v11, %v2885_v9 }
  0x14   :  { %1054 = vmatpush.bf16.msra.mxu0 %v2838_v56  ;;  %v3681_v15 = vld [vmem:[%s5902_s5 + $0x194] sm:$0xf0]  ;;  %v2950_v20 = vor.u32 %v3665_v13, %v2949_v12  ;;  %v2877_v21 = vld [vmem:[%s5902_s5 + $0x80] sm:$0xf]  ;;  %v3647_v22 = vld [vmem:[%s5902_s5 + $0x84] sm:$0xf0]  ;;  %v2814_v31 = vor.u32 %v3631_v18, %v2813_v17 }
  0x15   :  { %1067 = vmatpush.bf16.msra.mxu1 %v2902_v57  ;;  %v2941_v23 = vld [vmem:[%s5902_s5 + $0x100] sm:$0xf]  ;;  %v3014_v24 = vor.u32 %v3681_v15, %v3013_v14  ;;  %v3663_v25 = vld [vmem:[%s5902_s5 + $0x104] sm:$0xf0]  ;;  %v3125_v28 = vld [vmem:[%s5902_s5 + $0x270] sm:$0xf]  ;;  %v2878_v35 = vor.u32 %v3647_v22, %v2877_v21 }
  0x16   :  { %1080 = vmatpush.bf16.msra.mxu2 %v2966_v58  ;;  %v3005_v26 = vld [vmem:[%s5902_s5 + $0x180] sm:$0xf]  ;;  %v3679_v27 = vld [vmem:[%s5902_s5 + $0x184] sm:$0xf0]  ;;  %v3709_v29 = vld [vmem:[%s5902_s5 + $0x274] sm:$0xf0]  ;;  %v2942_v36 = vor.u32 %v3663_v25, %v2941_v23 }
  0x17   :  { %1093 = vmatpush.bf16.msra.mxu3 %v3030_v62  ;;  %v3189_v30 = vld [vmem:[%s5902_s5 + $0x2f0] sm:$0xf]  ;;  %v3725_v32 = vld [vmem:[%s5902_s5 + $0x2f4] sm:$0xf0]  ;;  %v3006_v39 = vor.u32 %v3679_v27, %v3005_v26  ;;  %v3126_v40 = vor.u32 %v3709_v29, %v3125_v28  ;;  %v3117_v43 = vld [vmem:[%s5902_s5 + $0x260] sm:$0xf] }
  0x18   :  { %1055 = vmatpush.bf16.msra.mxu0 %v2830_v4  ;;  %v3253_v33 = vld [vmem:[%s5902_s5 + $0x370] sm:$0xf]  ;;  %v3741_v34 = vld [vmem:[%s5902_s5 + $0x374] sm:$0xf0]  ;;  %v3190_v41 = vor.u32 %v3725_v32, %v3189_v30  ;;  %v3707_v44 = vld [vmem:[%s5902_s5 + $0x264] sm:$0xf0] }
  0x19   :  { %1068 = vmatpush.bf16.msra.mxu1 %v2894_v5  ;;  %v3317_v37 = vld [vmem:[%s5902_s5 + $0x3f0] sm:$0xf]  ;;  %v3757_v38 = vld [vmem:[%s5902_s5 + $0x3f4] sm:$0xf0]  ;;  %v3254_v42 = vor.u32 %v3741_v34, %v3253_v33  ;;  %v3181_v45 = vld [vmem:[%s5902_s5 + $0x2e0] sm:$0xf]  ;;  %v3118_v52 = vor.u32 %v3707_v44, %v3117_v43 }
  0x1a   :  { %1081 = vmatpush.bf16.msra.mxu2 %v2958_v6  ;;  %v3318_v46 = vor.u32 %v3757_v38, %v3317_v37  ;;  %v3723_v47 = vld [vmem:[%s5902_s5 + $0x2e4] sm:$0xf0]  ;;  %v3245_v48 = vld [vmem:[%s5902_s5 + $0x360] sm:$0xf]  ;;  %v3109_v53 = vld [vmem:[%s5902_s5 + $0x250] sm:$0xf] }
  0x1b   :  { %1094 = vmatpush.bf16.msra.mxu3 %v3022_v10  ;;  %v3739_v49 = vld [vmem:[%s5902_s5 + $0x364] sm:$0xf0]  ;;  %v3309_v50 = vld [vmem:[%s5902_s5 + $0x3e0] sm:$0xf]  ;;  %v3182_v54 = vor.u32 %v3723_v47, %v3181_v45  ;;  %v3705_v56 = vld [vmem:[%s5902_s5 + $0x254] sm:$0xf0] }
  0x1c   :  { %1056 = vmatpush.bf16.msra.mxu0 %v2822_v16  ;;  %v3755_v51 = vld [vmem:[%s5902_s5 + $0x3e4] sm:$0xf0]  ;;  %v3246_v55 = vor.u32 %v3739_v49, %v3245_v48  ;;  %v3173_v57 = vld [vmem:[%s5902_s5 + $0x2d0] sm:$0xf]  ;;  %v3721_v58 = vld [vmem:[%s5902_s5 + $0x2d4] sm:$0xf0]  ;;  %v3110_v0 = vor.u32 %v3705_v56, %v3109_v53 }
  0x1d   :  { %1069 = vmatpush.bf16.msra.mxu1 %v2886_v19  ;;  %v3310_v59 = vor.u32 %v3755_v51, %v3309_v50  ;;  %v3237_v60 = vld [vmem:[%s5902_s5 + $0x350] sm:$0xf]  ;;  %v3737_v61 = vld [vmem:[%s5902_s5 + $0x354] sm:$0xf0]  ;;  %v3174_v1 = vor.u32 %v3721_v58, %v3173_v57  ;;  %v45_v2 = vld [vmem:[%s5903_s0 + $0x8] sm:$0xff]  ;;  %vm2509_vm4 = vcmask 195584  }
  0x1e   :  { %1082 = vmatpush.bf16.msra.mxu2 %v2950_v20  ;;  %v3301_v62 = vld [vmem:[%s5902_s5 + $0x3d0] sm:$0xf]  ;;  %v3753_v63 = vld [vmem:[%s5902_s5 + $0x3d4] sm:$0xf0]  ;;  %v44_v3 = vld [vmem:[%s5903_s0] sm:$0xff]  ;;  %v3238_v4 = vor.u32 %v3737_v61, %v3237_v60  ;;  %v222_v8 = vunpack.c.l.b16 %v45_v2  ;;  %v223_v10 = vunpack.c.h.b16 %v45_v2  ;;  %vm2671_vm5 = vcmask 130112  }
  0x1f   :  { %1095 = vmatpush.bf16.msra.mxu3 %v3014_v24  ;;  %v3101_v5 = vld [vmem:[%s5902_s5 + $0x240] sm:$0xf]  ;;  %v3703_v6 = vld [vmem:[%s5902_s5 + $0x244] sm:$0xf0]  ;;  %v220_v9 = vunpack.c.l.b16 %v44_v3  ;;  %v3302_v11 = vor.u32 %v3753_v63, %v3301_v62  ;;  %v221_v15 = vunpack.c.h.b16 %v44_v3  ;;  %v3093_v25 = vld [vmem:[%s5902_s5 + $0x230] sm:$0xf] }
  0x20   :  { %1057 = vmatpush.bf16.msra.mxu0 %v2814_v31  ;;  %v3165_v7 = vld [vmem:[%s5902_s5 + $0x2c0] sm:$0xf]  ;;  %v3719_v12 = vld [vmem:[%s5902_s5 + $0x2c4] sm:$0xf0]  ;;  %v4204_v18 = vpack.c.b16 %v222_v8, %v222_v8  ;;  %v4208_v20 = vpack.c.b16 %v223_v10, %v223_v10  ;;  %v3102_v21 = vor.u32 %v3703_v6, %v3101_v5  ;;  %v3701_v26 = vld [vmem:[%s5902_s5 + $0x234] sm:$0xf0] }
  0x21   :  { %1070 = vmatpush.bf16.msra.mxu1 %v2878_v35  ;;  %v3229_v13 = vld [vmem:[%s5902_s5 + $0x340] sm:$0xf]  ;;  %v3735_v14 = vld [vmem:[%s5902_s5 + $0x344] sm:$0xf0]  ;;  %v4206_v19 = vpack.c.b16 %v220_v9, %v220_v9  ;;  %v4210_v22 = vpack.c.b16 %v221_v15, %v221_v15  ;;  %v3166_v23 = vor.u32 %v3719_v12, %v3165_v7  ;;  %v3157_v27 = vld [vmem:[%s5902_s5 + $0x2b0] sm:$0xf]  ;;  %v3094_v34 = vor.u32 %v3701_v26, %v3093_v25 }
  0x22   :  { %1083 = vmatpush.bf16.msra.mxu2 %v2942_v36  ;;  %v3293_v16 = vld [vmem:[%s5902_s5 + $0x3c0] sm:$0xf]  ;;  %v3751_v17 = vld [vmem:[%s5902_s5 + $0x3c4] sm:$0xf0]  ;;  %v3230_v24 = vor.u32 %v3735_v14, %v3229_v13  ;;  %v3717_v29 = vld [vmem:[%s5902_s5 + $0x2b4] sm:$0xf0] }
  0x23   :  { %1096 = vmatpush.bf16.msra.mxu3 %v3006_v39  ;;  %v3294_v28 = vor.u32 %v3751_v17, %v3293_v16  ;;  %v3221_v30 = vld [vmem:[%s5902_s5 + $0x330] sm:$0xf]  ;;  %v3733_v31 = vld [vmem:[%s5902_s5 + $0x334] sm:$0xf0]  ;;  %1058 = vmatmul.bf16.vlgmr.msra.gmra.mxu0 %v4206_v19  ;;  %v3158_v35 = vor.u32 %v3717_v29, %v3157_v27  ;;  %v3085_v37 = vld [vmem:[%s5902_s5 + $0x220] sm:$0xf] }
  0x24   :  { %1102 = vmatpush.bf16.msrb.mxu0 %v3126_v40  ;;  %v3285_v32 = vld [vmem:[%s5902_s5 + $0x3b0] sm:$0xf]  ;;  %v3749_v33 = vld [vmem:[%s5902_s5 + $0x3b4] sm:$0xf0]  ;;  %1071 = vmatmul.bf16.vlgmr.msra.gmra.mxu1 %v4210_v22  ;;  %v3222_v36 = vor.u32 %v3733_v31, %v3221_v30  ;;  %v3699_v38 = vld [vmem:[%s5902_s5 + $0x224] sm:$0xf0] }
  0x25   :  { %1115 = vmatpush.bf16.msrb.mxu1 %v3190_v41  ;;  %1084 = vmatmul.bf16.vlgmr.msra.gmra.mxu2 %v4204_v18  ;;  %v3149_v39 = vld [vmem:[%s5902_s5 + $0x2a0] sm:$0xf]  ;;  %v3286_v40 = vor.u32 %v3749_v33, %v3285_v32  ;;  %v3715_v41 = vld [vmem:[%s5902_s5 + $0x2a4] sm:$0xf0]  ;;  %v3077_v49 = vld [vmem:[%s5902_s5 + $0x210] sm:$0xf] }
  0x26   :  { %1128 = vmatpush.bf16.msrb.mxu2 %v3254_v42  ;;  %1097 = vmatmul.bf16.vlgmr.msra.gmra.mxu3 %v4208_v20  ;;  %v3213_v42 = vld [vmem:[%s5902_s5 + $0x320] sm:$0xf]  ;;  %v3731_v43 = vld [vmem:[%s5902_s5 + $0x324] sm:$0xf0]  ;;  %v3150_v47 = vor.u32 %v3715_v41, %v3149_v39  ;;  %v3697_v50 = vld [vmem:[%s5902_s5 + $0x214] sm:$0xf0] }
  0x27   :  { %1141 = vmatpush.bf16.msrb.mxu3 %v3318_v46  ;;  %v3277_v44 = vld [vmem:[%s5902_s5 + $0x3a0] sm:$0xf]  ;;  %v3747_v45 = vld [vmem:[%s5902_s5 + $0x3a4] sm:$0xf0]  ;;  %v3086_v46 = vor.u32 %v3699_v38, %v3085_v37  ;;  %v3214_v48 = vor.u32 %v3731_v43, %v3213_v42  ;;  %v3141_v51 = vld [vmem:[%s5902_s5 + $0x290] sm:$0xf] }
  0x28   :  { %1103 = vmatpush.bf16.msrb.mxu0 %v3118_v52  ;;  %v3278_v52 = vor.u32 %v3747_v45, %v3277_v44  ;;  %v3713_v53 = vld [vmem:[%s5902_s5 + $0x294] sm:$0xf0]  ;;  %v3269_v56 = vld [vmem:[%s5902_s5 + $0x390] sm:$0xf]  ;;  %v3069_v58 = vld [vmem:[%s5902_s5 + $0x200] sm:$0xf] }
  0x29   :  { %1116 = vmatpush.bf16.msrb.mxu1 %v3182_v54  ;;  %v3205_v54 = vld [vmem:[%s5902_s5 + $0x310] sm:$0xf]  ;;  %v3745_v57 = vld [vmem:[%s5902_s5 + $0x394] sm:$0xf0]  ;;  %v3695_v60 = vld [vmem:[%s5902_s5 + $0x204] sm:$0xf0]  ;;  %v3142_v63 = vor.u32 %v3713_v53, %v3141_v51 }
  0x2a   :  { %1129 = vmatpush.bf16.msrb.mxu2 %v3246_v55  ;;  %v3729_v55 = vld [vmem:[%s5902_s5 + $0x314] sm:$0xf0]  ;;  %v3133_v61 = vld [vmem:[%s5902_s5 + $0x280] sm:$0xf]  ;;  %v3711_v62 = vld [vmem:[%s5902_s5 + $0x284] sm:$0xf0] }
  0x2b   :  { %1142 = vmatpush.bf16.msrb.mxu3 %v3310_v59  ;;  %v3078_v59 = vor.u32 %v3697_v50, %v3077_v49  ;;  %v3727_v2 = vld [vmem:[%s5902_s5 + $0x304] sm:$0xf0]  ;;  %v47_v3 = vld [vmem:[%s5903_s0 + $0x18] sm:$0xff]  ;;  %v3261_v5 = vld [vmem:[%s5902_s5 + $0x380] sm:$0xf]  ;;  %v3134_v16 = vor.u32 %v3711_v62, %v3133_v61  ;;  %vm2752_vm6 = vcmask 138240  }
  0x2c   :  { %1104 = vmatpush.bf16.msrb.mxu0 %v3110_v0  ;;  %v3206_v0 = vor.u32 %v3729_v55, %v3205_v54  ;;  %v3743_v6 = vld [vmem:[%s5902_s5 + $0x384] sm:$0xf0]  ;;  %v46_v7 = vld [vmem:[%s5903_s0 + $0x10] sm:$0xff]  ;;  %v3773_v9 = vld [vmem:[%s5902_s5 + $0x474] sm:$0xf0]  ;;  %v226_v15 = vunpack.c.l.b16 %v47_v3  ;;  %v227_v25 = vunpack.c.h.b16 %v47_v3  ;;  %vm2769_vm7 = vcmask 146432  }
  0x2d   :  { %1117 = vmatpush.bf16.msrb.mxu1 %v3174_v1  ;;  %v3197_v1 = vld [vmem:[%s5902_s5 + $0x300] sm:$0xf]  ;;  %v3381_v8 = vld [vmem:[%s5902_s5 + $0x470] sm:$0xf]  ;;  %v3789_v12 = vld [vmem:[%s5902_s5 + $0x4f4] sm:$0xf0]  ;;  %v3262_v26 = vor.u32 %v3743_v6, %v3261_v5 }
  0x2e   :  { %1130 = vmatpush.bf16.msrb.mxu2 %v3238_v4  ;;  %v3270_v4 = vor.u32 %v3745_v57, %v3269_v56  ;;  %v3445_v10 = vld [vmem:[%s5902_s5 + $0x4f0] sm:$0xf]  ;;  %v3644_v13 = vld [vmem:[%s5902_s5 + $0x74] sm:$0xf]  ;;  %v2871_v14 = vld [vmem:[%s5902_s5 + $0x78] sm:$0xf0]  ;;  %v3198_v17 = vor.u32 %v3727_v2, %v3197_v1  ;;  %v3382_v27 = vor.u32 %v3773_v9, %v3381_v8  ;;  %v4360_v38 = vpack.c.b16 %v226_v15, %v226_v15 }
  0x2f   :  { %1143 = vmatpush.bf16.msrb.mxu3 %v3302_v11  ;;  %v3070_v11 = vor.u32 %v3695_v60, %v3069_v58  ;;  %v3446_v29 = vor.u32 %v3789_v12, %v3445_v10  ;;  %v2874_v30 = vor.u32 %v3644_v13, %v2871_v14  ;;  %v3373_v31 = vld [vmem:[%s5902_s5 + $0x460] sm:$0xf]  ;;  %v3771_v32 = vld [vmem:[%s5902_s5 + $0x464] sm:$0xf0]  ;;  %v2863_v37 = vld [vmem:[%s5902_s5 + $0x68] sm:$0xf0]  ;;  %v4370_v42 = vpack.c.b16 %v227_v25, %v227_v25 }
  0x30   :  { %1105 = vmatpush.bf16.msrb.mxu0 %v3102_v21  ;;  %v3660_v21 = vld [vmem:[%s5902_s5 + $0xf4] sm:$0xf]  ;;  %v3437_v33 = vld [vmem:[%s5902_s5 + $0x4e0] sm:$0xf]  ;;  %v3658_v39 = vld [vmem:[%s5902_s5 + $0xe4] sm:$0xf]  ;;  %v3374_v43 = vor.u32 %v3771_v32, %v3373_v31 }
  0x31   :  { %1118 = vmatpush.bf16.msrb.mxu1 %v3166_v23  ;;  %v2935_v23 = vld [vmem:[%s5902_s5 + $0xf8] sm:$0xf0]  ;;  %v3429_v49 = vld [vmem:[%s5902_s5 + $0x4d0] sm:$0xf]  ;;  %v3785_v51 = vld [vmem:[%s5902_s5 + $0x4d4] sm:$0xf0] }
  0x32   :  { %1131 = vmatpush.bf16.msrb.mxu2 %v3230_v24  ;;  %v224_v24 = vunpack.c.l.b16 %v46_v7  ;;  %v2855_v53 = vld [vmem:[%s5902_s5 + $0x58] sm:$0xf0]  ;;  %v3656_v54 = vld [vmem:[%s5902_s5 + $0xd4] sm:$0xf]  ;;  %v3430_v57 = vor.u32 %v3785_v51, %v3429_v49  ;;  %v3767_v60 = vld [vmem:[%s5902_s5 + $0x444] sm:$0xf0] }
  0x33   :  { %1144 = vmatpush.bf16.msrb.mxu3 %v3294_v28  ;;  %v225_v28 = vunpack.c.h.b16 %v46_v7  ;;  %v2919_v55 = vld [vmem:[%s5902_s5 + $0xd8] sm:$0xf0]  ;;  %v3421_v61 = vld [vmem:[%s5902_s5 + $0x4c0] sm:$0xf]  ;;  %v2847_v1 = vld [vmem:[%s5902_s5 + $0x48] sm:$0xf0] }
  0x34   :  { %1106 = vmatpush.bf16.msrb.mxu0 %v3094_v34  ;;  %v2938_v34 = vor.u32 %v3660_v21, %v2935_v23  ;;  %v4368_v41 = vpack.c.b16 %v224_v24, %v224_v24  ;;  %v2922_v62 = vor.u32 %v3656_v54, %v2919_v55  ;;  %v3654_v2 = vld [vmem:[%s5902_s5 + $0xc4] sm:$0xf]  ;;  %v2911_v3 = vld [vmem:[%s5902_s5 + $0xc8] sm:$0xf0]  ;;  %v3349_v7 = vld [vmem:[%s5902_s5 + $0x430] sm:$0xf] }
  0x35   :  { %1119 = vmatpush.bf16.msrb.mxu1 %v3158_v35  ;;  %v3787_v35 = vld [vmem:[%s5902_s5 + $0x4e4] sm:$0xf0]  ;;  %v4372_v44 = vpack.c.b16 %v225_v28, %v225_v28  ;;  %v3765_v8 = vld [vmem:[%s5902_s5 + $0x434] sm:$0xf0]  ;;  %v3413_v9 = vld [vmem:[%s5902_s5 + $0x4b0] sm:$0xf]  ;;  %v2914_v10 = vor.u32 %v3654_v2, %v2911_v3 }
  0x36   :  { %1132 = vmatpush.bf16.msrb.mxu2 %v3222_v36  ;;  %v3642_v36 = vld [vmem:[%s5902_s5 + $0x64] sm:$0xf]  ;;  %v3438_v45 = vor.u32 %v3787_v35, %v3437_v33  ;;  %v3636_v12 = vld [vmem:[%s5902_s5 + $0x34] sm:$0xf]  ;;  %v2839_v13 = vld [vmem:[%s5902_s5 + $0x38] sm:$0xf0] }
  0x37   :  { %1145 = vmatpush.bf16.msrb.mxu3 %v3286_v40  ;;  %v2927_v40 = vld [vmem:[%s5902_s5 + $0xe8] sm:$0xf0]  ;;  %v3652_v14 = vld [vmem:[%s5902_s5 + $0xb4] sm:$0xf]  ;;  %v2903_v15 = vld [vmem:[%s5902_s5 + $0xb8] sm:$0xf0]  ;;  %v2842_v21 = vor.u32 %v3636_v12, %v2839_v13 }
  0x38   :  { %1107 = vmatpush.bf16.msrb.mxu0 %v3086_v46  ;;  %v2866_v46 = vor.u32 %v3642_v36, %v2863_v37  ;;  %v2930_v50 = vor.u32 %v3658_v39, %v2927_v40  ;;  %v3341_v23 = vld [vmem:[%s5902_s5 + $0x420] sm:$0xf]  ;;  %v3763_v24 = vld [vmem:[%s5902_s5 + $0x424] sm:$0xf0]  ;;  %v3634_v28 = vld [vmem:[%s5902_s5 + $0x24] sm:$0xf] }
  0x39   :  { %1120 = vmatpush.bf16.msrb.mxu1 %v3150_v47  ;;  %v3365_v47 = vld [vmem:[%s5902_s5 + $0x450] sm:$0xf]  ;;  %v3405_v25 = vld [vmem:[%s5902_s5 + $0x4a0] sm:$0xf]  ;;  %v2895_v31 = vld [vmem:[%s5902_s5 + $0xa8] sm:$0xf0]  ;;  %v3342_v32 = vor.u32 %v3763_v24, %v3341_v23 }
  0x3a   :  { %1133 = vmatpush.bf16.msrb.mxu2 %v3214_v48  ;;  %v3769_v48 = vld [vmem:[%s5902_s5 + $0x454] sm:$0xf0]  ;;  %v3333_v35 = vld [vmem:[%s5902_s5 + $0x410] sm:$0xf]  ;;  %v3325_v49 = vld [vmem:[%s5902_s5 + $0x400] sm:$0xf] }
  0x3b   :  { %1146 = vmatpush.bf16.msrb.mxu3 %v3278_v52  ;;  %v3640_v52 = vld [vmem:[%s5902_s5 + $0x54] sm:$0xf]  ;;  %v3366_v56 = vor.u32 %v3769_v48, %v3365_v47  ;;  %v3761_v36 = vld [vmem:[%s5902_s5 + $0x414] sm:$0xf0]  ;;  %v3397_v37 = vld [vmem:[%s5902_s5 + $0x490] sm:$0xf] }
  0x3c   :  { %1108 = vmatpush.bf16.msrb.mxu0 %v3078_v59  ;;  %v2858_v58 = vor.u32 %v3640_v52, %v2855_v53  ;;  %v3357_v59 = vld [vmem:[%s5902_s5 + $0x440] sm:$0xf]  ;;  %v3777_v40 = vld [vmem:[%s5902_s5 + $0x494] sm:$0xf0]  ;;  %v2887_v47 = vld [vmem:[%s5902_s5 + $0x98] sm:$0xf0]  ;;  %v3334_v48 = vor.u32 %v3761_v36, %v3333_v35 }
  0x3d   :  { %1121 = vmatpush.bf16.msrb.mxu1 %v3142_v63  ;;  %v3783_v63 = vld [vmem:[%s5902_s5 + $0x4c4] sm:$0xf0]  ;;  %v3389_v51 = vld [vmem:[%s5902_s5 + $0x480] sm:$0xf]  ;;  %v3398_v52 = vor.u32 %v3777_v40, %v3397_v37  ;;  %v3630_v55 = vld [vmem:[%s5902_s5 + $0x4] sm:$0xf] }
  0x3e   :  { %1134 = vmatpush.bf16.msrb.mxu2 %v3206_v0  ;;  %v3638_v0 = vld [vmem:[%s5902_s5 + $0x44] sm:$0xf]  ;;  %v3422_v5 = vor.u32 %v3783_v63, %v3421_v61  ;;  %v3775_v54 = vld [vmem:[%s5902_s5 + $0x484] sm:$0xf0]  ;;  %v3676_v61 = vld [vmem:[%s5902_s5 + $0x174] sm:$0xf] }
  0x3f   :  { %1147 = vmatpush.bf16.msrb.mxu3 %v3270_v4  ;;  %v3358_v4 = vor.u32 %v3767_v60, %v3357_v59  ;;  %v2850_v6 = vor.u32 %v3638_v0, %v2847_v1  ;;  %v3646_v59 = vld [vmem:[%s5902_s5 + $0x84] sm:$0xf]  ;;  %v2879_v60 = vld [vmem:[%s5902_s5 + $0x88] sm:$0xf0]  ;;  %v3692_v63 = vld [vmem:[%s5902_s5 + $0x1f4] sm:$0xf] }
  0x40   :  { %1109 = vmatpush.bf16.msrb.mxu0 %v3070_v11  ;;  %v3781_v11 = vld [vmem:[%s5902_s5 + $0x4b4] sm:$0xf0]  ;;  %v3063_v1 = vld [vmem:[%s5902_s5 + $0x1f8] sm:$0xf0]  ;;  %v3708_v2 = vld [vmem:[%s5902_s5 + $0x274] sm:$0xf] }
  0x41   :  { %1122 = vmatpush.bf16.msrb.mxu1 %v3134_v16  ;;  %v3350_v16 = vor.u32 %v3765_v8, %v3349_v7  ;;  %v3127_v3 = vld [vmem:[%s5902_s5 + $0x278] sm:$0xf0]  ;;  %v3724_v7 = vld [vmem:[%s5902_s5 + $0x2f4] sm:$0xf]  ;;  %v3066_v12 = vor.u32 %v3692_v63, %v3063_v1  ;;  %v3055_v23 = vld [vmem:[%s5902_s5 + $0x1e8] sm:$0xf0] }
  0x42   :  { %1135 = vmatpush.bf16.msrb.mxu2 %v3198_v17  ;;  %v3414_v17 = vor.u32 %v3781_v11, %v3413_v9  ;;  %v3191_v8 = vld [vmem:[%s5902_s5 + $0x2f8] sm:$0xf0]  ;;  %v3130_v13 = vor.u32 %v3708_v2, %v3127_v3  ;;  %v3706_v24 = vld [vmem:[%s5902_s5 + $0x264] sm:$0xf]  ;;  %v3704_v37 = vld [vmem:[%s5902_s5 + $0x254] sm:$0xf] }
  0x43   :  { %1148 = vmatpush.bf16.msrb.mxu3 %v3262_v26  ;;  %1110 = vmatmul.bf16.vlgmr.msrb.gmra.mxu0 %v4368_v41  ;;  %v2906_v26 = vor.u32 %v3652_v14, %v2903_v15  ;;  %v3674_v14 = vld [vmem:[%s5902_s5 + $0x164] sm:$0xf]  ;;  %v2991_v15 = vld [vmem:[%s5902_s5 + $0x168] sm:$0xf0]  ;;  %v3047_v36 = vld [vmem:[%s5902_s5 + $0x1d8] sm:$0xf0] }
  0x44   :  { %1154 = vmatpush.bf16.msra.mxu0 %v3382_v27  ;;  %1123 = vmatmul.bf16.vlgmr.msrb.gmra.mxu1 %v4372_v44  ;;  %v3779_v27 = vld [vmem:[%s5902_s5 + $0x4a4] sm:$0xf0]  ;;  %v3720_v40 = vld [vmem:[%s5902_s5 + $0x2d4] sm:$0xf]  ;;  %v3159_v2 = vld [vmem:[%s5902_s5 + $0x2b8] sm:$0xf0] }
  0x45   :  { %1167 = vmatpush.bf16.msra.mxu1 %v3446_v29  ;;  %1136 = vmatmul.bf16.vlgmr.msrb.gmra.mxu2 %v4360_v38  ;;  %v2831_v29 = vld [vmem:[%s5902_s5 + $0x28] sm:$0xf0]  ;;  %v3406_v33 = vor.u32 %v3779_v27, %v3405_v25  ;;  %v3722_v27 = vld [vmem:[%s5902_s5 + $0x2e4] sm:$0xf]  ;;  %v3700_v63 = vld [vmem:[%s5902_s5 + $0x234] sm:$0xf] }
  0x46   :  { %1180 = vmatpush.bf16.msra.mxu2 %v2874_v30  ;;  %1149 = vmatmul.bf16.vlgmr.msrb.gmra.mxu3 %v4370_v42  ;;  %v3650_v30 = vld [vmem:[%s5902_s5 + $0xa4] sm:$0xf]  ;;  %v3119_v25 = vld [vmem:[%s5902_s5 + $0x268] sm:$0xf0]  ;;  %v3716_v1 = vld [vmem:[%s5902_s5 + $0x2b4] sm:$0xf] }
  0x47   :  { %1193 = vmatpush.bf16.msra.mxu3 %v2938_v34  ;;  %v2834_v34 = vor.u32 %v3634_v28, %v2831_v29  ;;  %v2898_v39 = vor.u32 %v3650_v30, %v2895_v31  ;;  %v3183_v28 = vld [vmem:[%s5902_s5 + $0x2e8] sm:$0xf0]  ;;  %v2994_v29 = vor.u32 %v3674_v14, %v2991_v15  ;;  %v3122_v31 = vor.u32 %v3706_v24, %v3119_v25  ;;  %v2951_v24 = vld [vmem:[%s5902_s5 + $0x118] sm:$0xf0]  ;;  %v3680_v25 = vld [vmem:[%s5902_s5 + $0x194] sm:$0xf] }
  0x48   :  { %1155 = vmatpush.bf16.msra.mxu0 %v3374_v43  ;;  %v3632_v43 = vld [vmem:[%s5902_s5 + $0x14] sm:$0xf]  ;;  %v3186_v35 = vor.u32 %v3722_v27, %v3183_v28  ;;  %v3151_v14 = vld [vmem:[%s5902_s5 + $0x2a8] sm:$0xf0]  ;;  %v3015_v28 = vld [vmem:[%s5902_s5 + $0x198] sm:$0xf0] }
  0x49   :  { %1168 = vmatpush.bf16.msra.mxu1 %v3438_v45  ;;  %v2823_v45 = vld [vmem:[%s5902_s5 + $0x18] sm:$0xf0]  ;;  %vm2786_vm8 = vcmask 154624  }
  0x4a   :  { %1181 = vmatpush.bf16.msra.mxu2 %v2866_v46  ;;  %v3648_v46 = vld [vmem:[%s5902_s5 + $0x94] sm:$0xf]  ;;  %v2826_v53 = vor.u32 %v3632_v43, %v2823_v45  ;;  %v3175_v43 = vld [vmem:[%s5902_s5 + $0x2d8] sm:$0xf0] }
  0x4b   :  { %1194 = vmatpush.bf16.msra.mxu3 %v2930_v50  ;;  %v3759_v50 = vld [vmem:[%s5902_s5 + $0x404] sm:$0xf0] }
  0x4c   :  { %1156 = vmatpush.bf16.msra.mxu0 %v3366_v56  ;;  %v48_v56 = vld [vmem:[%s5903_s0 + $0x20] sm:$0xff]  ;;  %v3326_v0 = vor.u32 %v3759_v50, %v3325_v49  ;;  %v2975_v49 = vld [vmem:[%s5902_s5 + $0x148] sm:$0xf0]  ;;  %v3178_v50 = vor.u32 %v3720_v40, %v3175_v43 }
  0x4d   :  { %1169 = vmatpush.bf16.msra.mxu1 %v3430_v57  ;;  %v2890_v57 = vor.u32 %v3648_v46, %v2887_v47  ;;  %v229_v9 = vunpack.c.h.b16 %v48_v56  ;;  %v3007_v40 = vld [vmem:[%s5902_s5 + $0x188] sm:$0xf0]  ;;  %v3694_v43 = vld [vmem:[%s5902_s5 + $0x204] sm:$0xf] }
  0x4e   :  { %1182 = vmatpush.bf16.msra.mxu2 %v2858_v58  ;;  %v2815_v58 = vld [vmem:[%s5902_s5 + $0x8] sm:$0xf0] }
  0x4f   :  { %1195 = vmatpush.bf16.msra.mxu3 %v2922_v62  ;;  %v2999_v62 = vld [vmem:[%s5902_s5 + $0x178] sm:$0xf0] }
  0x50   :  { %1157 = vmatpush.bf16.msra.mxu0 %v3358_v4  ;;  %v228_v4 = vunpack.c.l.b16 %v48_v56  ;;  %v3002_v11 = vor.u32 %v3676_v61, %v2999_v62  ;;  %v3031_v62 = vld [vmem:[%s5902_s5 + $0x1b8] sm:$0xf0] }
  0x51   :  { %1170 = vmatpush.bf16.msra.mxu1 %v3422_v5  ;;  %v3390_v5 = vor.u32 %v3775_v54, %v3389_v51  ;;  %v3702_v51 = vld [vmem:[%s5902_s5 + $0x244] sm:$0xf]  ;;  %v3167_v54 = vld [vmem:[%s5902_s5 + $0x2c8] sm:$0xf0] }
  0x52   :  { %1183 = vmatpush.bf16.msra.mxu2 %v2850_v6  ;;  %v2818_v6 = vor.u32 %v3630_v55, %v2815_v58  ;;  %v3668_v58 = vld [vmem:[%s5902_s5 + $0x134] sm:$0xf] }
  0x53   :  { %1196 = vmatpush.bf16.msra.mxu3 %v2914_v10  ;;  %v2882_v10 = vor.u32 %v3646_v59, %v2879_v60  ;;  %v2967_v59 = vld [vmem:[%s5902_s5 + $0x138] sm:$0xf0]  ;;  %v3684_v60 = vld [vmem:[%s5902_s5 + $0x1b4] sm:$0xf] }
  0x54   :  { %1158 = vmatpush.bf16.msra.mxu0 %v3350_v16  ;;  %v3690_v16 = vld [vmem:[%s5902_s5 + $0x1e4] sm:$0xf]  ;;  %v2970_v3 = vor.u32 %v3668_v58, %v2967_v59 }
  0x55   :  { %1171 = vmatpush.bf16.msra.mxu1 %v3414_v17  ;;  %v3194_v17 = vor.u32 %v3724_v7, %v3191_v8  ;;  %v3058_v30 = vor.u32 %v3690_v16, %v3055_v23  ;;  %v2959_v7 = vld [vmem:[%s5902_s5 + $0x128] sm:$0xf0]  ;;  %v3682_v8 = vld [vmem:[%s5902_s5 + $0x1a4] sm:$0xf]  ;;  %v3664_v23 = vld [vmem:[%s5902_s5 + $0x114] sm:$0xf] }
  0x56   :  { %1184 = vmatpush.bf16.msra.mxu2 %v2842_v21  ;;  %v4558_v21 = vpack.c.b16 %v228_v4, %v228_v4  ;;  %v3034_v4 = vor.u32 %v3684_v60, %v3031_v62  ;;  %v3738_v62 = vld [vmem:[%s5902_s5 + $0x364] sm:$0xf] }
  0x57   :  { %1197 = vmatpush.bf16.msra.mxu3 %v2906_v26  ;;  %v4569_v26 = vpack.c.b16 %v229_v9, %v229_v9  ;;  %v3162_v9 = vor.u32 %v3716_v1, %v3159_v2  ;;  %v3311_v2 = vld [vmem:[%s5902_s5 + $0x3e8] sm:$0xf0] }
  0x58   :  { %1159 = vmatpush.bf16.msra.mxu0 %v3342_v32  ;;  %v3672_v32 = vld [vmem:[%s5902_s5 + $0x154] sm:$0xf] }
  0x59   :  { %1172 = vmatpush.bf16.msra.mxu1 %v3406_v33  ;;  %v2983_v33 = vld [vmem:[%s5902_s5 + $0x158] sm:$0xf0] }
  0x5a   :  { %1185 = vmatpush.bf16.msra.mxu2 %v2834_v34  ;;  %v3688_v34 = vld [vmem:[%s5902_s5 + $0x1d4] sm:$0xf]  ;;  %v2986_v45 = vor.u32 %v3672_v32, %v2983_v33  ;;  %v3143_v32 = vld [vmem:[%s5902_s5 + $0x298] sm:$0xf0]  ;;  %v2954_v33 = vor.u32 %v3664_v23, %v2951_v24 }
  0x5b   :  { %1198 = vmatpush.bf16.msra.mxu3 %v2898_v39  ;;  %v3111_v39 = vld [vmem:[%s5902_s5 + $0x258] sm:$0xf0]  ;;  %v3050_v46 = vor.u32 %v3688_v34, %v3047_v36  ;;  %v3662_v34 = vld [vmem:[%s5902_s5 + $0x104] sm:$0xf]  ;;  %v3018_v36 = vor.u32 %v3680_v25, %v3015_v28  ;;  %v3231_v28 = vld [vmem:[%s5902_s5 + $0x348] sm:$0xf0] }
  0x5c   :  { %1160 = vmatpush.bf16.msra.mxu0 %v3334_v48  ;;  %v3114_v47 = vor.u32 %v3704_v37, %v3111_v39  ;;  %v3670_v48 = vld [vmem:[%s5902_s5 + $0x144] sm:$0xf] }
  0x5d   :  { %1173 = vmatpush.bf16.msra.mxu1 %v3398_v52  ;;  %v3103_v52 = vld [vmem:[%s5902_s5 + $0x248] sm:$0xf0]  ;;  %v2978_v55 = vor.u32 %v3670_v48, %v2975_v49  ;;  %v3678_v39 = vld [vmem:[%s5902_s5 + $0x184] sm:$0xf]  ;;  %v3740_v49 = vld [vmem:[%s5902_s5 + $0x374] sm:$0xf] }
  0x5e   :  { %1186 = vmatpush.bf16.msra.mxu2 %v2826_v53  ;;  %v3718_v53 = vld [vmem:[%s5902_s5 + $0x2c4] sm:$0xf]  ;;  %v3135_v48 = vld [vmem:[%s5902_s5 + $0x288] sm:$0xf0] }
  0x5f   :  { %1199 = vmatpush.bf16.msra.mxu3 %v2890_v57  ;;  %v3106_v57 = vor.u32 %v3702_v51, %v3103_v52  ;;  %v3170_v61 = vor.u32 %v3718_v53, %v3167_v54  ;;  %v3319_v51 = vld [vmem:[%s5902_s5 + $0x3f8] sm:$0xf0]  ;;  %v3772_v52 = vld [vmem:[%s5902_s5 + $0x474] sm:$0xf]  ;;  %v3010_v54 = vor.u32 %v3678_v39, %v3007_v40 }
  0x60   :  { %1161 = vmatpush.bf16.msra.mxu0 %v3326_v0  ;;  %v3095_v0 = vld [vmem:[%s5902_s5 + $0x238] sm:$0xf0]  ;;  %v3748_v39 = vld [vmem:[%s5902_s5 + $0x3b4] sm:$0xf] }
  0x61   :  { %1174 = vmatpush.bf16.msra.mxu1 %v3390_v5  ;;  %v3098_v5 = vor.u32 %v3700_v63, %v3095_v0  ;;  %v3383_v53 = vld [vmem:[%s5902_s5 + $0x478] sm:$0xf0]  ;;  %v3247_v63 = vld [vmem:[%s5902_s5 + $0x368] sm:$0xf0]  ;;  %v3754_v0 = vld [vmem:[%s5902_s5 + $0x3e4] sm:$0xf] }
  0x62   :  { %1187 = vmatpush.bf16.msra.mxu2 %v2818_v6  ;;  %v3666_v6 = vld [vmem:[%s5902_s5 + $0x124] sm:$0xf] }
  0x63   :  { %1200 = vmatpush.bf16.msra.mxu3 %v2882_v10  ;;  %1162 = vmatmul.bf16.vlgmr.msra.gmra.mxu0 %v4558_v21  ;;  %v3023_v10 = vld [vmem:[%s5902_s5 + $0x1a8] sm:$0xf0]  ;;  %v2962_v15 = vor.u32 %v3666_v6, %v2959_v7  ;;  %v3250_v7 = vor.u32 %v3738_v62, %v3247_v63  ;;  %v3728_v62 = vld [vmem:[%s5902_s5 + $0x314] sm:$0xf]  ;;  %v3207_v63 = vld [vmem:[%s5902_s5 + $0x318] sm:$0xf0] }
  0x64   :  { %1206 = vmatpush.bf16.msrb.mxu0 %v3002_v11  ;;  %1175 = vmatmul.bf16.vlgmr.msra.gmra.mxu1 %v4569_v26  ;;  %v3698_v11 = vld [vmem:[%s5902_s5 + $0x224] sm:$0xf]  ;;  %v3026_v16 = vor.u32 %v3682_v8, %v3023_v10  ;;  %v3439_v6 = vld [vmem:[%s5902_s5 + $0x4e8] sm:$0xf0]  ;;  %v3314_v8 = vor.u32 %v3754_v0, %v3311_v2  ;;  %v3736_v10 = vld [vmem:[%s5902_s5 + $0x354] sm:$0xf] }
  0x65   :  { %1219 = vmatpush.bf16.msrb.mxu1 %v3066_v12  ;;  %1188 = vmatmul.bf16.vlgmr.msra.gmra.mxu2 %v4206_v19  ;;  %v3686_v19 = vld [vmem:[%s5902_s5 + $0x1c4] sm:$0xf]  ;;  %v3087_v12 = vld [vmem:[%s5902_s5 + $0x228] sm:$0xf0]  ;;  %v3744_v0 = vld [vmem:[%s5902_s5 + $0x394] sm:$0xf] }
  0x66   :  { %1232 = vmatpush.bf16.msrb.mxu2 %v3130_v13  ;;  %1201 = vmatmul.bf16.vlgmr.msra.gmra.mxu3 %v4210_v22  ;;  %v3039_v22 = vld [vmem:[%s5902_s5 + $0x1c8] sm:$0xf0]  ;;  %v3714_v13 = vld [vmem:[%s5902_s5 + $0x2a4] sm:$0xf]  ;;  %v3271_v2 = vld [vmem:[%s5902_s5 + $0x398] sm:$0xf0] }
  0x67   :  { %1245 = vmatpush.bf16.msrb.mxu3 %v3194_v17  ;;  %v3042_v56 = vor.u32 %v3686_v19, %v3039_v22  ;;  %v3090_v17 = vor.u32 %v3698_v11, %v3087_v12  ;;  %v3154_v27 = vor.u32 %v3714_v13, %v3151_v14  ;;  %v3255_v19 = vld [vmem:[%s5902_s5 + $0x378] sm:$0xf0]  ;;  %v3752_v12 = vld [vmem:[%s5902_s5 + $0x3d4] sm:$0xf] }
  0x68   :  { %1207 = vmatpush.bf16.msrb.mxu0 %v2994_v29  ;;  %v3696_v29 = vld [vmem:[%s5902_s5 + $0x214] sm:$0xf]  ;;  %v3258_v59 = vor.u32 %v3740_v49, %v3255_v19  ;;  %v3239_v11 = vld [vmem:[%s5902_s5 + $0x358] sm:$0xf0] }
  0x69   :  { %1220 = vmatpush.bf16.msrb.mxu1 %v3058_v30  ;;  %v3079_v30 = vld [vmem:[%s5902_s5 + $0x218] sm:$0xf0]  ;;  %v3242_v23 = vor.u32 %v3736_v10, %v3239_v11  ;;  %v3726_v10 = vld [vmem:[%s5902_s5 + $0x304] sm:$0xf]  ;;  %v3199_v11 = vld [vmem:[%s5902_s5 + $0x308] sm:$0xf0] }
  0x6a   :  { %1233 = vmatpush.bf16.msrb.mxu2 %v3122_v31  ;;  %v3712_v31 = vld [vmem:[%s5902_s5 + $0x294] sm:$0xf]  ;;  %v3082_v37 = vor.u32 %v3696_v29, %v3079_v30  ;;  %v3303_v14 = vld [vmem:[%s5902_s5 + $0x3d8] sm:$0xf0]  ;;  %v3766_v29 = vld [vmem:[%s5902_s5 + $0x444] sm:$0xf] }
  0x6b   :  { %1246 = vmatpush.bf16.msrb.mxu3 %v3186_v35  ;;  %v2943_v35 = vld [vmem:[%s5902_s5 + $0x108] sm:$0xf0]  ;;  %v3306_v24 = vor.u32 %v3752_v12, %v3303_v14  ;;  %v3742_v12 = vld [vmem:[%s5902_s5 + $0x384] sm:$0xf] }
  0x6c   :  { %1208 = vmatpush.bf16.msrb.mxu0 %v2986_v45  ;;  %v3146_v45 = vor.u32 %v3712_v31, %v3143_v32  ;;  %v2946_v22 = vor.u32 %v3662_v34, %v2943_v35  ;;  %v3359_v30 = vld [vmem:[%s5902_s5 + $0x448] sm:$0xf0]  ;;  %v3782_v31 = vld [vmem:[%s5902_s5 + $0x4c4] sm:$0xf] }
  0x6d   :  { %1221 = vmatpush.bf16.msrb.mxu1 %v3050_v46  ;;  %v3071_v46 = vld [vmem:[%s5902_s5 + $0x208] sm:$0xf0]  ;;  %v3362_v35 = vor.u32 %v3766_v29, %v3359_v30  ;;  %v3511_v29 = vld [vmem:[%s5904_s7 + $0x78] sm:$0xf0] }
  0x6e   :  { %1234 = vmatpush.bf16.msrb.mxu2 %v3114_v47  ;;  %v3710_v47 = vld [vmem:[%s5902_s5 + $0x284] sm:$0xf]  ;;  %v3423_v32 = vld [vmem:[%s5902_s5 + $0x4c8] sm:$0xf0] }
  0x6f   :  { %1247 = vmatpush.bf16.msrb.mxu3 %v3178_v50  ;;  %v3756_v50 = vld [vmem:[%s5902_s5 + $0x3f4] sm:$0xf]  ;;  %v3138_v58 = vor.u32 %v3710_v47, %v3135_v48  ;;  %v3426_v40 = vor.u32 %v3782_v31, %v3423_v32  ;;  %v3415_v48 = vld [vmem:[%s5902_s5 + $0x4b8] sm:$0xf0]  ;;  %v3263_v14 = vld [vmem:[%s5902_s5 + $0x388] sm:$0xf0] }
  0x70   :  { %1209 = vmatpush.bf16.msrb.mxu0 %v2978_v55  ;;  %v3074_v55 = vor.u32 %v3694_v43, %v3071_v46  ;;  %v3322_v60 = vor.u32 %v3756_v50, %v3319_v51  ;;  %v3287_v43 = vld [vmem:[%s5902_s5 + $0x3b8] sm:$0xf0]  ;;  %v3780_v47 = vld [vmem:[%s5902_s5 + $0x4b4] sm:$0xf]  ;;  %v3215_v51 = vld [vmem:[%s5902_s5 + $0x328] sm:$0xf0] }
  0x71   :  { %1222 = vmatpush.bf16.msrb.mxu1 %v3042_v56  ;;  %v3788_v56 = vld [vmem:[%s5902_s5 + $0x4f4] sm:$0xf]  ;;  %v3351_v46 = vld [vmem:[%s5902_s5 + $0x438] sm:$0xf0]  ;;  %v3290_v19 = vor.u32 %v3748_v39, %v3287_v43  ;;  %v3501_v31 = vld [vmem:[%s5904_s7 + $0x60] sm:$0xf] }
  0x72   :  { %1235 = vmatpush.bf16.msrb.mxu2 %v3106_v57  ;;  %v3447_v57 = vld [vmem:[%s5902_s5 + $0x4f8] sm:$0xf0]  ;;  %v3803_v32 = vld [vmem:[%s5904_s7 + $0x64] sm:$0xf0]  ;;  %v3485_v39 = vld [vmem:[%s5904_s7 + $0x40] sm:$0xf] }
  0x73   :  { %1248 = vmatpush.bf16.msrb.mxu3 %v3170_v61  ;;  %v3386_v61 = vor.u32 %v3772_v52, %v3383_v53  ;;  %v3450_v1 = vor.u32 %v3788_v56, %v3447_v57  ;;  %v3746_v52 = vld [vmem:[%s5902_s5 + $0x3a4] sm:$0xf]  ;;  %v3418_v53 = vor.u32 %v3780_v47, %v3415_v48  ;;  %v3343_v56 = vld [vmem:[%s5902_s5 + $0x428] sm:$0xf0] }
  0x74   :  { %1210 = vmatpush.bf16.msrb.mxu0 %v2970_v3  ;;  %v3770_v3 = vld [vmem:[%s5902_s5 + $0x464] sm:$0xf]  ;;  %v3487_v47 = vld [vmem:[%s5904_s7 + $0x48] sm:$0xf0] }
  0x75   :  { %1223 = vmatpush.bf16.msrb.mxu1 %v3034_v4  ;;  %v3375_v4 = vld [vmem:[%s5902_s5 + $0x468] sm:$0xf0]  ;;  %v3778_v57 = vld [vmem:[%s5902_s5 + $0x4a4] sm:$0xf] }
  0x76   :  { %1236 = vmatpush.bf16.msrb.mxu2 %v3098_v5  ;;  %v3786_v5 = vld [vmem:[%s5902_s5 + $0x4e4] sm:$0xf] }
  0x77   :  { %1249 = vmatpush.bf16.msrb.mxu3 %v3162_v9  ;;  %v3378_v9 = vor.u32 %v3770_v3, %v3375_v4  ;;  %v3442_v13 = vor.u32 %v3786_v5, %v3439_v6  ;;  %v3760_v3 = vld [vmem:[%s5902_s5 + $0x414] sm:$0xf]  ;;  %v3335_v4 = vld [vmem:[%s5902_s5 + $0x418] sm:$0xf0] }
  0x78   :  { %1211 = vmatpush.bf16.msrb.mxu0 %v2962_v15  ;;  %v3768_v15 = vld [vmem:[%s5902_s5 + $0x454] sm:$0xf]  ;;  %v3399_v6 = vld [vmem:[%s5902_s5 + $0x498] sm:$0xf0] }
  0x79   :  { %1224 = vmatpush.bf16.msrb.mxu1 %v3026_v16  ;;  %v3367_v16 = vld [vmem:[%s5902_s5 + $0x458] sm:$0xf0]  ;;  %v3776_v5 = vld [vmem:[%s5902_s5 + $0x494] sm:$0xf] }
  0x7a   :  { %1237 = vmatpush.bf16.msrb.mxu2 %v3090_v17  ;;  %v3784_v17 = vld [vmem:[%s5902_s5 + $0x4d4] sm:$0xf]  ;;  %v3370_v25 = vor.u32 %v3768_v15, %v3367_v16  ;;  %v3758_v15 = vld [vmem:[%s5902_s5 + $0x404] sm:$0xf]  ;;  %v3327_v16 = vld [vmem:[%s5902_s5 + $0x408] sm:$0xf0] }
  0x7b   :  { %1250 = vmatpush.bf16.msrb.mxu3 %v3154_v27  ;;  %v3734_v27 = vld [vmem:[%s5902_s5 + $0x344] sm:$0xf] }
  0x7c   :  { %1212 = vmatpush.bf16.msrb.mxu0 %v2954_v33  ;;  %v3234_v33 = vor.u32 %v3734_v27, %v3231_v28  ;;  %v3509_v28 = vld [vmem:[%s5904_s7 + $0x70] sm:$0xf] }
  0x7d   :  { %1225 = vmatpush.bf16.msrb.mxu1 %v3018_v36  ;;  %v3732_v36 = vld [vmem:[%s5902_s5 + $0x334] sm:$0xf] }
  0x7e   :  { %1238 = vmatpush.bf16.msrb.mxu2 %v3082_v37  ;;  %v3223_v37 = vld [vmem:[%s5902_s5 + $0x338] sm:$0xf0] }
  0x7f   :  { %1251 = vmatpush.bf16.msrb.mxu3 %v3146_v45  ;;  %v3764_v45 = vld [vmem:[%s5902_s5 + $0x434] sm:$0xf]  ;;  %v3226_v49 = vor.u32 %v3732_v36, %v3223_v37  ;;  %v3495_v37 = vld [vmem:[%s5904_s7 + $0x58] sm:$0xf0] }
  0x80   :  { %1213 = vmatpush.bf16.msrb.mxu0 %v2946_v22  ;;  %v3354_v50 = vor.u32 %v3764_v45, %v3351_v46  ;;  %v3730_v22 = vld [vmem:[%s5902_s5 + $0x324] sm:$0xf] }
  0x81   :  { %1226 = vmatpush.bf16.msrb.mxu1 %v3010_v54  ;;  %v3279_v54 = vld [vmem:[%s5902_s5 + $0x3a8] sm:$0xf0]  ;;  %v3798_v46 = vld [vmem:[%s5904_s7 + $0x44] sm:$0xf] }
  0x82   :  { %1239 = vmatpush.bf16.msrb.mxu2 %v3074_v55  ;;  %v3762_v55 = vld [vmem:[%s5902_s5 + $0x424] sm:$0xf] }
  0x83   :  { %1252 = vmatpush.bf16.msrb.mxu3 %v3138_v58  ;;  %1214 = vmatmul.bf16.vlgmr.msrb.gmra.mxu0 %v4204_v18  ;;  %v3750_v18 = vld [vmem:[%s5902_s5 + $0x3c4] sm:$0xf]  ;;  %v3407_v58 = vld [vmem:[%s5902_s5 + $0x4a8] sm:$0xf0] }
  0x84   :  { %1258 = vmatpush.bf16.msra.mxu0 %v3258_v59  ;;  %1227 = vmatmul.bf16.vlgmr.msrb.gmra.mxu1 %v4208_v20  ;;  %v3295_v20 = vld [vmem:[%s5902_s5 + $0x3c8] sm:$0xf0]  ;;  %v3218_v59 = vor.u32 %v3730_v22, %v3215_v51  ;;  %v3797_v22 = vld [vmem:[%s5904_s7 + $0x34] sm:$0xf0]  ;;  %v3796_v51 = vld [vmem:[%s5904_s7 + $0x34] sm:$0xf] }
  0x85   :  { %1271 = vmatpush.bf16.msra.mxu1 %v3322_v60  ;;  %1240 = vmatmul.bf16.vlgmr.msrb.gmra.mxu2 %v4368_v41  ;;  %v3431_v41 = vld [vmem:[%s5902_s5 + $0x4d8] sm:$0xf0]  ;;  %v3298_v34 = vor.u32 %v3750_v18, %v3295_v20  ;;  %v3282_v60 = vor.u32 %v3746_v52, %v3279_v54  ;;  %v3805_v18 = vld [vmem:[%s5904_s7 + $0x74] sm:$0xf0] }
  0x86   :  { %1284 = vmatpush.bf16.msra.mxu2 %v3386_v61  ;;  %1253 = vmatmul.bf16.vlgmr.msrb.gmra.mxu3 %v4372_v44  ;;  %v3434_v44 = vor.u32 %v3784_v17, %v3431_v41  ;;  %v3346_v61 = vor.u32 %v3762_v55, %v3343_v56  ;;  %v3774_v17 = vld [vmem:[%s5902_s5 + $0x484] sm:$0xf]  ;;  %v3391_v41 = vld [vmem:[%s5902_s5 + $0x488] sm:$0xf0]  ;;  %v3510_v20 = vor.u32 %v3805_v18, %v3509_v28  ;;  %v3479_v52 = vld [vmem:[%s5904_s7 + $0x38] sm:$0xf0] }
  0x87   :  { %1297 = vmatpush.bf16.msra.mxu3 %v3450_v1  ;;  %v3410_v1 = vor.u32 %v3778_v57, %v3407_v58  ;;  %v3394_v27 = vor.u32 %v3774_v17, %v3391_v41  ;;  %v3482_v56 = vor.u32 %v3796_v51, %v3479_v52  ;;  %v3469_v57 = vld [vmem:[%s5904_s7 + $0x20] sm:$0xf]  ;;  %v3795_v58 = vld [vmem:[%s5904_s7 + $0x24] sm:$0xf0] }
  0x88   :  { %1259 = vmatpush.bf16.msra.mxu0 %v3250_v7  ;;  %v3210_v7 = vor.u32 %v3728_v62, %v3207_v63  ;;  %v3470_v63 = vor.u32 %v3795_v58, %v3469_v57  ;;  %v3533_v51 = vld [vmem:[%s5904_s7 + $0xa0] sm:$0xf]  ;;  %v3811_v52 = vld [vmem:[%s5904_s7 + $0xa4] sm:$0xf0] }
  0x89   :  { %1272 = vmatpush.bf16.msra.mxu1 %v3314_v8  ;;  %v3274_v8 = vor.u32 %v3744_v0, %v3271_v2 }
  0x8a   :  { %1285 = vmatpush.bf16.msra.mxu2 %v3378_v9  ;;  %v3338_v9 = vor.u32 %v3760_v3, %v3335_v4  ;;  %v5000_v3 = vld [vmem:[%s5905_s6] sm:$0x3] }
  0x8b   :  { %1298 = vmatpush.bf16.msra.mxu3 %v3442_v13  ;;  %v3402_v13 = vor.u32 %v3776_v5, %v3399_v6  ;;  %v211_v4 = vperm.slane %v5000_v3, 0  ;;  %v3461_v5 = vld [vmem:[%s5904_s7 + $0x10] sm:$0xf]  ;;  %v3793_v6 = vld [vmem:[%s5904_s7 + $0x14] sm:$0xf0] }
  0x8c   :  { %1260 = vmatpush.bf16.msra.mxu0 %v3242_v23  ;;  %v3202_v23 = vor.u32 %v3726_v10, %v3199_v11  ;;  %v3462_v10 = vor.u32 %v3793_v6, %v3461_v5  ;;  %v3463_v11 = vld [vmem:[%s5904_s7 + $0x18] sm:$0xf0]  ;;  %v3517_v5 = vld [vmem:[%s5904_s7 + $0x80] sm:$0xf]  ;;  %v3807_v6 = vld [vmem:[%s5904_s7 + $0x84] sm:$0xf0] }
  0x8d   :  { %1273 = vmatpush.bf16.msra.mxu1 %v3306_v24  ;;  %v3266_v24 = vor.u32 %v3742_v12, %v3263_v14  ;;  %v3453_v14 = vld [vmem:[%s5904_s7] sm:$0xf] }
  0x8e   :  { %1286 = vmatpush.bf16.msra.mxu2 %v3370_v25  ;;  %v3330_v25 = vor.u32 %v3758_v15, %v3327_v16  ;;  %v3791_v15 = vld [vmem:[%s5904_s7 + $0x4] sm:$0xf0]  ;;  %v3790_v16 = vld [vmem:[%s5904_s7 + $0x4] sm:$0xf] }
  0x8f   :  { %1299 = vmatpush.bf16.msra.mxu3 %v3434_v44  ;;  %v3804_v44 = vld [vmem:[%s5904_s7 + $0x74] sm:$0xf]  ;;  %v3454_v41 = vor.u32 %v3791_v15, %v3453_v14 }
  0x90   :  { %1261 = vmatpush.bf16.msra.mxu0 %v3234_v33  ;;  %v3514_v30 = vor.u32 %v3804_v44, %v3511_v29  ;;  %v3502_v33 = vor.u32 %v3803_v32, %v3501_v31 }
  0x91   :  { %1274 = vmatpush.bf16.msra.mxu1 %v3298_v34  ;;  %v3801_v34 = vld [vmem:[%s5904_s7 + $0x54] sm:$0xf0] }
  0x92   :  { %1287 = vmatpush.bf16.msra.mxu2 %v3362_v35  ;;  %v3800_v35 = vld [vmem:[%s5904_s7 + $0x54] sm:$0xf] }
  0x93   :  { %1300 = vmatpush.bf16.msra.mxu3 %v3426_v40  ;;  %v3799_v40 = vld [vmem:[%s5904_s7 + $0x44] sm:$0xf0]  ;;  %v3498_v45 = vor.u32 %v3800_v35, %v3495_v37 }
  0x94   :  { %1262 = vmatpush.bf16.msra.mxu0 %v3226_v49  ;;  %v3486_v49 = vor.u32 %v3799_v40, %v3485_v39 }
  0x95   :  { %1275 = vmatpush.bf16.msra.mxu1 %v3290_v19  ;;  %v3490_v19 = vor.u32 %v3798_v46, %v3487_v47  ;;  %v3541_v47 = vld [vmem:[%s5904_s7 + $0xb0] sm:$0xf] }
  0x96   :  { %1288 = vmatpush.bf16.msra.mxu2 %v3354_v50  ;;  %v3477_v50 = vld [vmem:[%s5904_s7 + $0x30] sm:$0xf] }
  0x97   :  { %1301 = vmatpush.bf16.msra.mxu3 %v3418_v53  ;;  %v3478_v54 = vor.u32 %v3797_v22, %v3477_v50  ;;  %v3543_v50 = vld [vmem:[%s5904_s7 + $0xb8] sm:$0xf0] }
  0x98   :  { %1263 = vmatpush.bf16.msra.mxu0 %v3218_v59  ;;  %v3794_v59 = vld [vmem:[%s5904_s7 + $0x24] sm:$0xf] }
  0x99   :  { %1276 = vmatpush.bf16.msra.mxu1 %v3282_v60  ;;  %v3471_v60 = vld [vmem:[%s5904_s7 + $0x28] sm:$0xf0] }
  0x9a   :  { %1289 = vmatpush.bf16.msra.mxu2 %v3346_v61  ;;  %v3474_v0 = vor.u32 %v3794_v59, %v3471_v60  ;;  %v3525_v59 = vld [vmem:[%s5904_s7 + $0x90] sm:$0xf]  ;;  %v3809_v60 = vld [vmem:[%s5904_s7 + $0x94] sm:$0xf0] }
  0x9b   :  { %1302 = vmatpush.bf16.msra.mxu3 %v3410_v1 }
  0x9c   :  { %1264 = vmatpush.bf16.msra.mxu0 %v3210_v7  ;;  %v3792_v7 = vld [vmem:[%s5904_s7 + $0x14] sm:$0xf] }
  0x9d   :  { %1277 = vmatpush.bf16.msra.mxu1 %v3274_v8 }
  0x9e   :  { %1290 = vmatpush.bf16.msra.mxu2 %v3338_v9 }
  0x9f   :  { %1303 = vmatpush.bf16.msra.mxu3 %v3402_v13  ;;  %v3466_v13 = vor.u32 %v3792_v7, %v3463_v11 }
  0xa0   :  { %1265 = vmatpush.bf16.msra.mxu0 %v3202_v23  ;;  %v1059_v43 = vpop.f32.mrf.mxu0  ;;  %v3455_v23 = vld [vmem:[%s5904_s7 + $0x8] sm:$0xf0] }
  0xa1   :  { %1278 = vmatpush.bf16.msra.mxu1 %v3266_v24  ;;  %v1072_v48 = vpop.f32.mrf.mxu1  ;;  %v1060_v8 = vadd.f32 %v1059_v43, %v211_v4 }
  0xa2   :  { %1291 = vmatpush.bf16.msra.mxu2 %v3330_v25  ;;  %v3458_v25 = vor.u32 %v3790_v16, %v3455_v23 }
  0xa3   :  { %1304 = vmatpush.bf16.msra.mxu3 %v3394_v27  ;;  %1266 = vmatmul.bf16.vlgmr.msra.gmra.mxu0 %v4360_v38  ;;  %v3802_v38 = vld [vmem:[%s5904_s7 + $0x64] sm:$0xf]  ;;  %v1073_v17 = vadd.f32 %v1072_v48, %v1060_v8  ;;  %v3813_v48 = vld [vmem:[%s5904_s7 + $0xb4] sm:$0xf0] }
  0xa4   :  { %1279 = vmatmul.bf16.vlgmr.msra.gmra.mxu1 %v4370_v42  ;;  %1468 = vmatpush.bf16.msrb.mxu0 %v3510_v20  ;;  %v3503_v42 = vld [vmem:[%s5904_s7 + $0x68] sm:$0xf0] }
  0xa5   :  { %1292 = vmatmul.bf16.vlgmr.msra.gmra.mxu2 %v4558_v21  ;;  %v3506_v21 = vor.u32 %v3802_v38, %v3503_v42 }
  0xa6   :  { %1305 = vmatmul.bf16.vlgmr.msra.gmra.mxu3 %v4569_v26  ;;  %1494 = vmatpush.bf16.msrb.mxu2 %v3514_v30  ;;  %v3493_v26 = vld [vmem:[%s5904_s7 + $0x50] sm:$0xf] }
  0xa7   :  { %v3494_v36 = vor.u32 %v3801_v34, %v3493_v26 }
  0xa8   :  { %1469 = vmatpush.bf16.msrb.mxu0 %v3502_v33  ;;  %v1085_v53 = vpop.f32.mrf.mxu2  ;;  %v1061_v61 = vpop.f32.mrf.mxu0 }
  0xa9   :  { %v1098_v55 = vpop.f32.mrf.mxu3  ;;  %v1074_v62 = vpop.f32.mrf.mxu1  ;;  %v1086_v28 = vadd.f32 %v1085_v53, %v1073_v17  ;;  %v3810_v53 = vld [vmem:[%s5904_s7 + $0xa4] sm:$0xf]  ;;  %v3808_v61 = vld [vmem:[%s5904_s7 + $0x94] sm:$0xf] }
  0xaa   :  { %1495 = vmatpush.bf16.msrb.mxu2 %v3506_v21  ;;  %v212_v62 = vperm.slane %v5000_v3, 1  ;;  %v3806_v3 = vld [vmem:[%s5904_s7 + $0x84] sm:$0xf] }
  0xab   :  { %v1099_v20 = vadd.f32 %v1098_v55, %v1086_v28  ;;  %v3534_v55 = vor.u32 %v3811_v52, %v3533_v51  ;;  %v3823_v51 = vld [vmem:[%s5906_s9 + $0x48] sm:$0xff]  ;;  %v1791_v52 = vld [vmem:[%s5907_s1 + $0x30] sm:$0xff] }
  0xac   :  { %1470 = vmatpush.bf16.msrb.mxu0 %v3494_v36 }
  0xae   :  { %1496 = vmatpush.bf16.msrb.mxu2 %v3498_v45 }
  0xb0   :  { %1471 = vmatpush.bf16.msrb.mxu0 %v3486_v49  ;;  %v1087_v1 = vpop.f32.mrf.mxu2  ;;  %v3812_v49 = vld [vmem:[%s5904_s7 + $0xb4] sm:$0xf] }
  0xb1   :  { %v1100_v2 = vpop.f32.mrf.mxu3  ;;  %v3546_v22 = vor.u32 %v3812_v49, %v3543_v50  ;;  %v3815_v49 = vld [vmem:[%s5906_s9 + $0x8] sm:$0xff]  ;;  %v3824_v50 = vld [vmem:[%s5906_s9 + $0x50] sm:$0xff] }
  0xb2   :  { %1497 = vmatpush.bf16.msrb.mxu2 %v3490_v19  ;;  %v3542_v19 = vor.u32 %v3813_v48, %v3541_v47  ;;  %v3837_v47 = vmov 0   ;;  %v1785_v48 = vld [vmem:[%s5907_s1] sm:$0xff] }
  0xb3   :  { %1511 = vmatpush.bf16.msrb.mxu3 %v3546_v22  ;;  %3833 = vset.pattern.permute.xlu0 %v3837_v47  ;;  %v3814_v22 = vld [vmem:[%s5906_s9] sm:$0xff] }
  0xb4   :  { %1472 = vmatpush.bf16.msrb.mxu0 %v3478_v54  ;;  %1485 = vmatpush.bf16.msrb.mxu1 %v3542_v19  ;;  %v1786_v19 = vld [vmem:[%s5907_s1 + $0x8] sm:$0xff] }
  0xb5   :  { %3834 = vset.pattern.permute.xlu1 %v3837_v47  ;;  %1835 = vperm.xlu0 %3833, %v1785_v48   ;;  %v3836_v48 = vld [vmem:[%s5908_s10] ss:$0 sm:$0xff] }
  0xb6   :  { %1498 = vmatpush.bf16.msrb.mxu2 %v3482_v56  ;;  %v3535_v56 = vld [vmem:[%s5904_s7 + $0xa8] sm:$0xf0]  ;;  %3835 = vset.pattern.permute.xlu2 %v3837_v47 }
  0xb7   :  { %v3538_v58 = vor.u32 %v3810_v53, %v3535_v56  ;;  %v3822_v53 = vld [vmem:[%s5906_s9 + $0x40] sm:$0xff] }
  0xb8   :  { %1473 = vmatpush.bf16.msrb.mxu0 %v3470_v63  ;;  %1486 = vmatpush.bf16.msrb.mxu1 %v3534_v55  ;;  %v3526_v63 = vor.u32 %v3809_v60, %v3525_v59  ;;  %v1794_v55 = vld [vmem:[%s5907_s1 + $0x48] sm:$0xff]  ;;  %v1789_v56 = vld [vmem:[%s5907_s1 + $0x20] sm:$0xff] }
  0xb9   :  { %1512 = vmatpush.bf16.msrb.mxu3 %v3538_v58  ;;  %1855 = vperm.xlu2 %3835, %v1789_v56   ;;  %v1797_v58 = vld [vmem:[%s5907_s1 + $0x60] sm:$0xff]  ;;  %v1790_v60 = vld [vmem:[%s5907_s1 + $0x28] sm:$0xff]  ;;  %v1657_v56 = vld [vmem:[%s5912_s4 + $0x10] sm:$0xff] }
  0xba   :  { %1499 = vmatpush.bf16.msrb.mxu2 %v3474_v0  ;;  %v3527_v0 = vld [vmem:[%s5904_s7 + $0x98] sm:$0xf0]  ;;  %v1338_v59 = vld [vmem:[%s5909_s8] sm:$0x3] }
  0xbb   :  { %v3530_v2 = vor.u32 %v3808_v61, %v3527_v0  ;;  %v1340_v61 = vperm.slane %v1338_v59, 0 }
  0xbc   :  { %1474 = vmatpush.bf16.msrb.mxu0 %v3462_v10  ;;  %1487 = vmatpush.bf16.msrb.mxu1 %v3526_v63  ;;  %v3519_v10 = vld [vmem:[%s5904_s7 + $0x88] sm:$0xf0]  ;;  %v1800_v63 = vld [vmem:[%s5907_s1 + $0x78] sm:$0xff] }
  0xbd   :  { %1513 = vmatpush.bf16.msrb.mxu3 %v3530_v2  ;;  %1840 = vperm.xlu0 %3833, %v1786_v19   ;;  %v1341_v2 = vperm.slane %v1338_v59, 1  ;;  %v1667_v59 = vld [vmem:[%s5912_s4 + $0x60] sm:$0xff] }
  0xbe   :  { %1500 = vmatpush.bf16.msrb.mxu2 %v3466_v13 }
  0xc0   :  { %v1111_v9 = vpop.f32.mrf.mxu0  ;;  %1475 = vmatpush.bf16.msrb.mxu0 %v3454_v41 }
  0xc1   :  { %v1124_v12 = vpop.f32.mrf.mxu1  ;;  %v1112_v31 = vadd.f32 %v1111_v9, %v1099_v20  ;;  %v3518_v9 = vor.u32 %v3807_v6, %v3517_v5  ;;  %1860 = vperm.xlu2 %3835, %v1790_v60   ;;  %v1793_v5 = vld [vmem:[%s5907_s1 + $0x40] sm:$0xff] }
  0xc2   :  { %1501 = vmatpush.bf16.msrb.mxu2 %v3458_v25  ;;  %v1659_v60 = vld [vmem:[%s5912_s4 + $0x20] sm:$0xff] }
  0xc3   :  { %v1125_v32 = vadd.f32 %v1124_v12, %v1112_v31  ;;  %v3522_v12 = vor.u32 %v3806_v3, %v3519_v10  ;;  %1488 = vmatpush.bf16.msrb.mxu1 %v3518_v9  ;;  %v1795_v3 = vld [vmem:[%s5907_s1 + $0x50] sm:$0xff] }
  0xc4   :  { %v1819_v10 = vld [vmem:[%s5910_s3 + $0x10] sm:$0xff] }
  0xc5   :  { %1514 = vmatpush.bf16.msrb.mxu3 %v3522_v12  ;;  %1865 = vperm.xlu0 %3833, %v1791_v52   ;;  %v1664_v52 = vld [vmem:[%s5912_s4 + $0x48] sm:$0xff] }
  0xc8   :  { %v1137_v24 = vpop.f32.mrf.mxu2  ;;  %v1113_v18 = vpop.f32.mrf.mxu0 }
  0xc9   :  { %v1150_v27 = vpop.f32.mrf.mxu3  ;;  %v1126_v44 = vpop.f32.mrf.mxu1  ;;  %v1138_v38 = vadd.f32 %v1137_v24, %v1125_v32  ;;  %1875 = vperm.xlu2 %3835, %v1793_v5   ;;  %v1663_v5 = vld [vmem:[%s5912_s4 + $0x40] sm:$0xff] }
  0xcb   :  { %v1151_v33 = vadd.f32 %v1150_v27, %v1138_v38 }
  0xcd   :  { %1880 = vperm.xlu0 %3833, %v1794_v55   ;;  %v1665_v55 = vld [vmem:[%s5912_s4 + $0x50] sm:$0xff] }
  0xd0   :  { %v1139_v29 = vpop.f32.mrf.mxu2 }
  0xd1   :  { %v1152_v30 = vpop.f32.mrf.mxu3 }
  0xd5   :  { %1895 = vperm.xlu0 %3833, %v1797_v58   ;;  %v1658_v58 = vld [vmem:[%s5912_s4 + $0x18] sm:$0xff] }
  0xdd   :  { %1910 = vperm.xlu0 %3833, %v1800_v63   ;;  %v1669_v63 = vld [vmem:[%s5912_s4 + $0x70] sm:$0xff] }
  0xe0   :  { %v1163_v42 = vpop.f32.mrf.mxu0 }
  0xe1   :  { %v1164_v21 = vadd.f32 %v1163_v42, %v1151_v33  ;;  %v1176_v26 = vpop.f32.mrf.mxu1 }
  0xe3   :  { %v1177_v34 = vadd.f32 %v1176_v26, %v1164_v21  ;;  %v3821_v21 = vld [vmem:[%s5906_s9 + $0x38] sm:$0xff]  ;;  %v3820_v26 = vld [vmem:[%s5906_s9 + $0x30] sm:$0xff] }
  0xe4   :  { %1627 = vmatpush.bf16.msra.mxu1 %v3821_v21  ;;  %v1832_v21 = vld [vmem:[%s5910_s3 + $0x78] sm:$0xff] }
  0xe5   :  { %v1310_v35 = vmax.f32 %v1177_v34, 0.0  ;;  %v3825_v34 = vld [vmem:[%s5906_s9 + $0x58] sm:$0xff]  ;;  %1941 = vperm.xlu0 %3833, %v1819_v10  }
  0xe6   :  { %1644 = vmatpush.bf16.msra.mxu3 %v3825_v34  ;;  %v1802_v34 = vld [vmem:[%s5911_s2 + $0x8] sm:$0xff] }
  0xe7   :  { %v1312_v36 = vpack.c.bf16 %v1310_v35, %v1310_v35  ;;  %v3819_v35 = vld [vmem:[%s5906_s9 + $0x28] sm:$0xff] }
  0xe8   :  { %v1189_v37 = vpop.f32.mrf.mxu2  ;;  %v1165_v40 = vpop.f32.mrf.mxu0  ;;  %1628 = vmatpush.bf16.msra.mxu1 %v3820_v26  ;;  %v1811_v26 = vld [vmem:[%s5911_s2 + $0x50] sm:$0xff] }
  0xe9   :  { %v1202_v39 = vpop.f32.mrf.mxu3  ;;  %1476 = vmatmul.bf16.vlgmr.msrb.gmra.mxu0 %v1312_v36  ;;  %1502 = vmatmul.bf16.vlgmr.msrb.gmra.mxu2 %v1312_v36  ;;  %v1178_v43 = vpop.f32.mrf.mxu1  ;;  %v1190_v7 = vadd.f32 %v1189_v37, %v212_v62  ;;  %v3818_v36 = vld [vmem:[%s5906_s9 + $0x20] sm:$0xff]  ;;  %v3817_v37 = vld [vmem:[%s5906_s9 + $0x18] sm:$0xff]  ;;  %v3816_v40 = vld [vmem:[%s5906_s9 + $0x10] sm:$0xff] }
  0xea   :  { %1645 = vmatpush.bf16.msra.mxu3 %v3824_v50  ;;  %v1792_v62 = vld [vmem:[%s5907_s1 + $0x38] sm:$0xff] }
  0xeb   :  { %v1203_v13 = vadd.f32 %v1202_v39, %v1190_v7 }
  0xec   :  { %1629 = vmatpush.bf16.msra.mxu1 %v3819_v35  ;;  %v1812_v35 = vld [vmem:[%s5911_s2 + $0x58] sm:$0xff] }
  0xee   :  { %1646 = vmatpush.bf16.msra.mxu3 %v3823_v51  ;;  %v1655_v51 = vld [vmem:[%s5912_s4] sm:$0xff] }
  0xf0   :  { %v1191_v45 = vpop.f32.mrf.mxu2  ;;  %1630 = vmatpush.bf16.msra.mxu1 %v3818_v36  ;;  %v1810_v36 = vld [vmem:[%s5911_s2 + $0x48] sm:$0xff] }
  0xf1   :  { %v1204_v46 = vpop.f32.mrf.mxu3 }
  0xf2   :  { %1647 = vmatpush.bf16.msra.mxu3 %v3822_v53 }
  0xf4   :  { %1631 = vmatpush.bf16.msra.mxu1 %v3817_v37  ;;  %v1813_v37 = vld [vmem:[%s5911_s2 + $0x60] sm:$0xff] }
  0xf8   :  { %1632 = vmatpush.bf16.msra.mxu1 %v3816_v40  ;;  %v1814_v40 = vld [vmem:[%s5911_s2 + $0x68] sm:$0xff] }
  0xfc   :  { %1633 = vmatpush.bf16.msra.mxu1 %v3815_v49 }
 0x100   :  { %v1215_v54 = vpop.f32.mrf.mxu0  ;;  %1634 = vmatpush.bf16.msra.mxu1 %v3814_v22 }
 0x101   :  { %v1228_v57 = vpop.f32.mrf.mxu1  ;;  %v1216_v16 = vadd.f32 %v1215_v54, %v1203_v13  ;;  %v1787_v54 = vld [vmem:[%s5907_s1 + $0x10] sm:$0xff] }
 0x102   :  { %1845 = vperm.xlu1 %3834, %v1787_v54   ;;  %v1656_v54 = vld [vmem:[%s5912_s4 + $0x8] sm:$0xff] }
 0x103   :  { %v1229_v17 = vadd.f32 %v1228_v57, %v1216_v16  ;;  %v1788_v57 = vld [vmem:[%s5907_s1 + $0x18] sm:$0xff]  ;;  %v1798_v16 = vld [vmem:[%s5907_s1 + $0x68] sm:$0xff] }
 0x108   :  { %v1241_v1 = vpop.f32.mrf.mxu2  ;;  %v1217_v8 = vpop.f32.mrf.mxu0 }
 0x109   :  { %v1254_v4 = vpop.f32.mrf.mxu3  ;;  %v1230_v11 = vpop.f32.mrf.mxu1  ;;  %v1242_v41 = vadd.f32 %v1241_v1, %v1229_v17 }
 0x10a   :  { %1850 = vperm.xlu1 %3834, %v1788_v57   ;;  %v1666_v57 = vld [vmem:[%s5912_s4 + $0x58] sm:$0xff] }
 0x10b   :  { %v1255_v23 = vadd.f32 %v1254_v4, %v1242_v41  ;;  %v1822_v41 = vld [vmem:[%s5910_s3 + $0x28] sm:$0xff] }
 0x10c   :  { %1956 = vperm.xlu0 %3833, %v1822_v41  }
 0x110   :  { %v1243_v14 = vpop.f32.mrf.mxu2 }
 0x111   :  { %v1256_v15 = vpop.f32.mrf.mxu3  ;;  %v1796_v14 = vld [vmem:[%s5907_s1 + $0x58] sm:$0xff] }
 0x112   :  { %1870 = vperm.xlu1 %3834, %v1792_v62   ;;  %1890 = vperm.xlu2 %3835, %v1796_v14   ;;  %v1660_v62 = vld [vmem:[%s5912_s4 + $0x28] sm:$0xff] }
 0x11a   :  { %1885 = vperm.xlu1 %3834, %v1795_v3  }
 0x120   :  { %v1267_v24 = vpop.f32.mrf.mxu0 }
 0x121   :  { %v1280_v25 = vpop.f32.mrf.mxu1  ;;  %v1268_v27 = vadd.f32 %v1267_v24, %v1255_v23  ;;  %v1799_v23 = vld [vmem:[%s5907_s1 + $0x70] sm:$0xff]  ;;  %v1817_v24 = vld [vmem:[%s5910_s3] sm:$0xff] }
 0x122   :  { %1900 = vperm.xlu1 %3834, %v1798_v16   ;;  %1905 = vperm.xlu2 %3835, %v1799_v23  }
 0x123   :  { %v1281_v28 = vadd.f32 %v1280_v25, %v1268_v27  ;;  %v1825_v25 = vld [vmem:[%s5910_s3 + $0x40] sm:$0xff]  ;;  %v1818_v27 = vld [vmem:[%s5910_s3 + $0x8] sm:$0xff] }
 0x124   :  { %1971 = vperm.xlu0 %3833, %v1825_v25  }
 0x128   :  { %v1293_v18 = vpop.f32.mrf.mxu2  ;;  %v1269_v29 = vpop.f32.mrf.mxu0 }
 0x129   :  { %v1294_v44 = vadd.f32 %v1293_v18, %v1281_v28  ;;  %v1306_v20 = vpop.f32.mrf.mxu3  ;;  %v1282_v30 = vpop.f32.mrf.mxu1  ;;  %v1820_v28 = vld [vmem:[%s5910_s3 + $0x18] sm:$0xff]  ;;  %v1831_v29 = vld [vmem:[%s5910_s3 + $0x70] sm:$0xff] }
 0x12a   :  { %1931 = vperm.xlu1 %3834, %v1817_v24   ;;  %1936 = vperm.xlu2 %3835, %v1818_v27   ;;  %v1828_v18 = vld [vmem:[%s5910_s3 + $0x58] sm:$0xff]  ;;  %v1826_v30 = vld [vmem:[%s5910_s3 + $0x48] sm:$0xff] }
 0x12b   :  { %v1307_v31 = vadd.f32 %v1306_v20, %v1294_v44  ;;  %v1821_v44 = vld [vmem:[%s5910_s3 + $0x20] sm:$0xff]  ;;  %v1823_v20 = vld [vmem:[%s5910_s3 + $0x30] sm:$0xff] }
 0x12c   :  { %1986 = vperm.xlu0 %3833, %v1828_v18  }
 0x12d   :  { %v1311_v32 = vmax.f32 %v1307_v31, 0.0  ;;  %v1824_v31 = vld [vmem:[%s5910_s3 + $0x38] sm:$0xff] }
 0x12f   :  { %v1313_v38 = vpack.c.bf16 %v1311_v32, %v1311_v32  ;;  %v1801_v32 = vld [vmem:[%s5911_s2] sm:$0xff] }
 0x130   :  { %v1295_v33 = vpop.f32.mrf.mxu2 }
 0x131   :  { %v1308_v42 = vpop.f32.mrf.mxu3  ;;  %3547 = vmatmul.msk.bf16.vlgmr.msrb.gmra.mxu1 %vm1464_vm0, %v1313_v38  ;;  %3548 = vmatmul.msk.bf16.vlgmr.msrb.gmra.mxu3 %vm1464_vm0, %v1313_v38  ;;  %v1829_v38 = vld [vmem:[%s5910_s3 + $0x60] sm:$0xff]  ;;  %v1827_v33 = vld [vmem:[%s5910_s3 + $0x50] sm:$0xff] }
 0x132   :  { %1946 = vperm.xlu1 %3834, %v1820_v28   ;;  %1951 = vperm.xlu2 %3835, %v1821_v44   ;;  %v1808_v42 = vld [vmem:[%s5911_s2 + $0x38] sm:$0xff] }
 0x134   :  { %2001 = vperm.xlu0 %3833, %v1831_v29  }
 0x13a   :  { %1961 = vperm.xlu1 %3834, %v1823_v20   ;;  %1966 = vperm.xlu2 %3835, %v1824_v31  }
 0x13c   :  { %2123 = vperm.xlu0 %3833, %v1801_v32  }
 0x142   :  { %1976 = vperm.xlu1 %3834, %v1826_v30   ;;  %1981 = vperm.xlu2 %3835, %v1827_v33  }
 0x144   :  { %2158 = vperm.xlu0 %3833, %v1808_v42  }
 0x14a   :  { %1991 = vperm.xlu1 %3834, %v1829_v38  }
 0x14c   :  { %2173 = vperm.xlu0 %3833, %v1811_v26  }
 0x152   :  { %2006 = vperm.xlu1 %3834, %v1832_v21  }
 0x154   :  { %2178 = vperm.xlu0 %3833, %v1812_v35  }
 0x15a   :  { %2128 = vperm.xlu1 %3834, %v1802_v34  }
 0x15c   :  { %2183 = vperm.xlu0 %3833, %v1813_v37  }
 0x162   :  { %2168 = vperm.xlu1 %3834, %v1810_v36  }
 0x164   :  { %2188 = vperm.xlu0 %3833, %v1814_v40  }
 0x166   :  { %v1477_v39 = vpop.f32.mrf.mxu0 }
 0x167   :  { %v1478_v0 = vadd.f32 %v1477_v39, %v1340_v61  ;;  %v1804_v39 = vld [vmem:[%s5911_s2 + $0x18] sm:$0xff]  ;;  %v1668_v61 = vld [vmem:[%s5912_s4 + $0x68] sm:$0xff] }
 0x16a   :  { %2138 = vperm.xlu1 %3834, %v1804_v39  }
 0x16c   :  { %v1503_v43 = vpop.f32.mrf.mxu2 }
 0x16d   :  { %v1504_v7 = vadd.f32 %v1503_v43, %v1341_v2  ;;  %v1830_v43 = vld [vmem:[%s5910_s3 + $0x68] sm:$0xff] }
 0x16e   :  { %v1479_v45 = vpop.f32.mrf.mxu0  ;;  %1996 = vperm.xlu2 %3835, %v1830_v43  }
 0x16f   :  { %v1803_v45 = vld [vmem:[%s5911_s2 + $0x10] sm:$0xff] }
 0x174   :  { %v1505_v46 = vpop.f32.mrf.mxu2  ;;  %v5309_v2 = vpop.permute.xlu1 %1845 }
 0x175   :  { %v1809_v46 = vld [vmem:[%s5911_s2 + $0x40] sm:$0xff] }
 0x176   :  { %2133 = vperm.xlu2 %3835, %v1803_v45  }
 0x17c   :  { %v5320_v3 = vpop.permute.xlu1 %1850 }
 0x17e   :  { %2163 = vperm.xlu2 %3835, %v1809_v46  }
 0x1ae   :  { %v1490_v1 = vpop.f32.mrf.mxu1 }
 0x1af   :  { %v1491_v4 = vadd.f32 %v1490_v1, %v1478_v0  ;;  %v1661_v0 = vld [vmem:[%s5912_s4 + $0x30] sm:$0xff]  ;;  %v1670_v1 = vld [vmem:[%s5912_s4 + $0x78] sm:$0xff] }
 0x1b1   :  { %v1520_v6 = vmax.f32 %v1491_v4, 0.0  ;;  %v1662_v4 = vld [vmem:[%s5912_s4 + $0x38] sm:$0xff]  ;;  %s3838_s4 = smov 104  }
 0x1b3   :  { %v1522_v8 = vpack.c.bf16 %v1520_v6, %v1520_v6  ;;  %v5318_v6 = vpop.permute.xlu2 %1855 }
 0x1b4   :  { %v1516_v9 = vpop.f32.mrf.mxu3 }
 0x1b5   :  { %v1517_v11 = vadd.f32 %v1516_v9, %v1504_v7  ;;  %1635 = vmatmul.bf16.vlgmr.msra.gmra.mxu1 %v1522_v8  ;;  %v5323_v7 = vpop.permute.xlu0 %1835  ;;  %v5327_v9 = vpop.permute.xlu1 %1870 }
 0x1b6   :  { %v1492_v12 = vpop.f32.mrf.mxu1 }
 0x1b7   :  { %v1521_v13 = vmax.f32 %v1517_v11, 0.0 }
 0x1b9   :  { %v1523_v15 = vpack.c.bf16 %v1521_v13, %v1521_v13 }
 0x1bb   :  { %3597 = vmatmul.msk.bf16.vlgmr.msra.gmra.mxu3 %vm1464_vm0, %v1523_v15  ;;  %v5325_v8 = vpop.permute.xlu2 %1860 }
 0x1bc   :  { %v1518_v17 = vpop.f32.mrf.mxu3 }
 0x1bd   :  { %v5329_v10 = vpop.permute.xlu0 %1840  ;;  %v5333_v12 = vpop.permute.xlu1 %1885 }
 0x1c3   :  { %v5331_v11 = vpop.permute.xlu2 %1875 }
 0x1c5   :  { %v5335_v13 = vpop.permute.xlu0 %1865  ;;  %v5339_v15 = vpop.permute.xlu1 %1900 }
 0x1c6   :  { %5917 = vst [vmem:[#allocation2_spill] sm:$0xff] %v5335_v13 }
 0x1cb   :  { %v5337_v14 = vpop.permute.xlu2 %1890 }
 0x1cd   :  { %v5341_v16 = vpop.permute.xlu0 %1880  ;;  %v1932_v41 = vpop.permute.xlu1 %1931 }
 0x1d3   :  { %v5343_v17 = vpop.permute.xlu2 %1905 }
 0x1d5   :  { %v5345_v23 = vpop.permute.xlu0 %1895  ;;  %v1947_v25 = vpop.permute.xlu1 %1946 }
 0x1db   :  { %v1937_v24 = vpop.permute.xlu2 %1936 }
 0x1dd   :  { %v5347_v27 = vpop.permute.xlu0 %1910  ;;  %v1962_v18 = vpop.permute.xlu1 %1961 }
 0x1e3   :  { %v1952_v28 = vpop.permute.xlu2 %1951 }
 0x1e5   :  { %v1942_v29 = vpop.permute.xlu0 %1941  ;;  %v1977_v32 = vpop.permute.xlu1 %1976 }
 0x1eb   :  { %v1967_v31 = vpop.permute.xlu2 %1966 }
 0x1ed   :  { %v1957_v21 = vpop.permute.xlu0 %1956  ;;  %v1992_v45 = vpop.permute.xlu1 %1991 }
 0x1f3   :  { %v1982_v35 = vpop.permute.xlu2 %1981 }
 0x1f5   :  { %v1972_v39 = vpop.permute.xlu0 %1971 }
 0x232   :  { %v1636_v47 = vpop.f32.mrf.mxu1 }
 0x233   :  { %v1637_v19 = vadd.f32 %v3836_v48, %v1636_v47  ;;  %v1987_v48 = vpop.permute.xlu0 %1986 }
 0x23a   :  { %v1638_v49 = vpop.f32.mrf.mxu1 }
 0x23e   :  { %v1649_v50 = vpop.f32.mrf.mxu3 }
 0x23f   :  { %v1650_v22 = vadd.f32 %v1649_v50, %v1637_v19 }
 0x241   :  { %1654 = vst.msk [vmem:[%s5913_s12] sm:$0xff] %vm1653_vm1, %v1650_v22  ;;  %1735 = vmatpush.msra.mxu0 %v1650_v22  ;;  %3826 = vmatpush.msrb.mxu3 %v1650_v22 }
 0x242   :  { %3598 = vmatmul.msk.f32.vlgmr.msra.gmra.mxu0 %vm1671_vm2, %v1655_v51  ;;  %3607 = vmatmul.msk.f32.vlgmr.msrb.gmra.mxu3 %vm1671_vm2, %v1664_v52 }
 0x246   :  { %v1651_v53 = vpop.f32.mrf.mxu3 }
 0x247   :  { %v1997_v53 = vpop.permute.xlu2 %1996 }
 0x24a   :  { %3599 = vmatmul.msk.f32.gmra.mxu0 %vm1671_vm2, %v1656_v54  ;;  %3608 = vmatmul.msk.f32.gmra.mxu3 %vm1671_vm2, %v1665_v55 }
 0x252   :  { %3600 = vmatmul.msk.f32.gmra.mxu0 %vm1671_vm2, %v1657_v56  ;;  %3609 = vmatmul.msk.f32.gmra.mxu3 %vm1671_vm2, %v1666_v57  ;;  %v2002_v57 = vpop.permute.xlu0 %2001 }
 0x25a   :  { %3601 = vmatmul.msk.f32.gmra.mxu0 %vm1671_vm2, %v1658_v58  ;;  %3610 = vmatmul.msk.f32.gmra.mxu3 %vm1671_vm2, %v1667_v59 }
 0x262   :  { %3602 = vmatmul.msk.f32.gmra.mxu0 %vm1671_vm2, %v1659_v60  ;;  %3611 = vmatmul.msk.f32.gmra.mxu3 %vm1671_vm2, %v1668_v61 }
 0x26a   :  { %3603 = vmatmul.msk.f32.gmra.mxu0 %vm1671_vm2, %v1660_v62  ;;  %3612 = vmatmul.msk.f32.gmra.mxu3 %vm1671_vm2, %v1669_v63  ;;  %v2007_v62 = vpop.permute.xlu1 %2006  ;;  %v2124_v63 = vpop.permute.xlu0 %2123 }
 0x272   :  { %3604 = vmatmul.msk.f32.gmra.mxu0 %vm1671_vm2, %v1661_v0  ;;  %3613 = vmatmul.msk.f32.gmra.mxu3 %vm1671_vm2, %v1670_v1 }
 0x27a   :  { %3605 = vmatmul.msk.f32.gmra.mxu0 %vm1671_vm2, %v1662_v4 }
 0x282   :  { %3606 = vmatmul.msk.f32.gmra.mxu0 %vm1671_vm2, %v1663_v5 }
 0x2bf   :  { %v5349_v44 = vpop.f32.mrf.mxu0 }
 0x2c0   :  { %v2009_v20 = vmul.f32 %v1932_v41, %v5349_v44  ;;  %v2129_v41 = vpop.permute.xlu1 %2128 }
 0x2c2   :  { %2217 = vrot.lane.b32.xlu1 %v2009_v20, %s3838_s4  ;;  %2041 = vrot.lane.b32.xlu2 %v2009_v20, %s3839_s17  ;;  %v2134_v20 = vpop.permute.xlu2 %2133 }
 0x2c5   :  { %v5354_v30 = vpop.f32.mrf.mxu3 }
 0x2c6   :  { %v2018_v33 = vmul.f32 %v1977_v32, %v5354_v30 }
 0x2c7   :  { %v5356_v38 = vpop.f32.mrf.mxu0 }
 0x2c8   :  { %v2010_v42 = vmul.f32 %v1937_v24, %v5356_v38 }
 0x2ca   :  { %2059 = vrot.lane.b32.xlu2 %v2018_v33, %s3839_s17  ;;  %2219 = vrot.lane.b32.xlu1 %v2010_v42, %s3838_s4 }
 0x2cb   :  { %2043 = vrot.lane.b32.xlu0 %v2010_v42, %s3839_s17 }
 0x2cd   :  { %v5363_v26 = vpop.f32.mrf.mxu3 }
 0x2ce   :  { %v2019_v37 = vmul.f32 %v1982_v35, %v5363_v26  ;;  %v2201_v35 = vmul.f32 %v2124_v63, %v5349_v44 }
 0x2cf   :  { %v5365_v34 = vpop.f32.mrf.mxu0 }
 0x2d0   :  { %v2011_v36 = vmul.f32 %v1942_v29, %v5365_v34  ;;  %v1815_v29 = vld [vmem:[%s5911_s2 + $0x70] sm:$0xff] }
 0x2d2   :  { %2235 = vrot.lane.b32.xlu2 %v2018_v33, %s3838_s4  ;;  %2045 = vrot.lane.b32.xlu1 %v2011_v36, %s3839_s17  ;;  %v2164_v33 = vpop.permute.xlu2 %2163 }
 0x2d3   :  { %2061 = vrot.lane.b32.xlu0 %v2019_v37, %s3839_s17 }
 0x2d5   :  { %v5372_v40 = vpop.f32.mrf.mxu3 }
 0x2d6   :  { %v2020_v19 = vmul.f32 %v1987_v48, %v5372_v40  ;;  %v1816_v48 = vld [vmem:[%s5911_s2 + $0x78] sm:$0xff] }
 0x2d7   :  { %v5374_v43 = vpop.f32.mrf.mxu0 }
 0x2d8   :  { %v2012_v51 = vmul.f32 %v1947_v25, %v5374_v43  ;;  %v2159_v25 = vpop.permute.xlu0 %2158 }
 0x2da   :  { %2237 = vrot.lane.b32.xlu2 %v2019_v37, %s3838_s4  ;;  %2221 = vrot.lane.b32.xlu1 %v2011_v36, %s3838_s4  ;;  %v1806_v36 = vld [vmem:[%s5911_s2 + $0x28] sm:$0xff] }
 0x2dd   :  { %v5378_v46 = vpop.f32.mrf.mxu3 }
 0x2de   :  { %v2021_v47 = vmul.f32 %v1992_v45, %v5378_v46 }
 0x2df   :  { %v5381_v49 = vpop.f32.mrf.mxu0 }
 0x2e0   :  { %2241 = vrot.lane.b32.xlu0 %v2021_v47, %s3838_s4  ;;  %v2013_v50 = vmul.f32 %v1952_v28, %v5381_v49  ;;  %v1805_v28 = vld [vmem:[%s5911_s2 + $0x20] sm:$0xff]  ;;  %v2174_v42 = vpop.permute.xlu0 %2173 }
 0x2e2   :  { %2239 = vrot.lane.b32.xlu2 %v2020_v19, %s3838_s4  ;;  %2063 = vrot.lane.b32.xlu1 %v2020_v19, %s3839_s17 }
 0x2e5   :  { %v5392_v52 = vpop.f32.mrf.mxu3 }
 0x2e6   :  { %v2022_v54 = vmul.f32 %v1997_v53, %v5392_v52 }
 0x2e7   :  { %v5388_v22 = vpop.f32.mrf.mxu0 }
 0x2e8   :  { %2049 = vrot.lane.b32.xlu0 %v2013_v50, %s3839_s17  ;;  %v2014_v56 = vmul.f32 %v1957_v21, %v5388_v22 }
 0x2ea   :  { %2223 = vrot.lane.b32.xlu1 %v2012_v51, %s3838_s4  ;;  %2047 = vrot.lane.b32.xlu2 %v2012_v51, %s3839_s17  ;;  %v1807_v51 = vld [vmem:[%s5911_s2 + $0x30] sm:$0xff] }
 0x2ed   :  { %v5403_v58 = vpop.f32.mrf.mxu3 }
 0x2ee   :  { %v2023_v59 = vmul.f32 %v2002_v57, %v5403_v58 }
 0x2ef   :  { %v5397_v55 = vpop.f32.mrf.mxu0 }
 0x2f0   :  { %2067 = vrot.lane.b32.xlu0 %v2022_v54, %s3839_s17  ;;  %v2015_v60 = vmul.f32 %v1962_v18, %v5397_v55 }
 0x2f2   :  { %2065 = vrot.lane.b32.xlu2 %v2021_v47, %s3839_s17  ;;  %2051 = vrot.lane.b32.xlu1 %v2014_v56, %s3839_s17  ;;  %v2211_v47 = vmul.f32 %v2174_v42, %v5363_v26 }
 0x2f5   :  { %v5412_v0 = vpop.f32.mrf.mxu3 }
 0x2f6   :  { %v2024_v4 = vmul.f32 %v2007_v62, %v5412_v0 }
 0x2f7   :  { %v5408_v61 = vpop.f32.mrf.mxu0 }
 0x2f8   :  { %2243 = vrot.lane.b32.xlu0 %v2022_v54, %s3838_s4  ;;  %v2016_v1 = vmul.f32 %v1967_v31, %v5408_v61  ;;  %v5426_v18 = vmul.f32 %v2159_v25, %v5408_v61  ;;  %v2169_v31 = vpop.permute.xlu1 %2168 }
 0x2f9   :  { %v2210_v32 = vmul.f32 %v2169_v31, %v5354_v30 }
 0x2fa   :  { %2069 = vrot.lane.b32.xlu1 %v2023_v59, %s3839_s17  ;;  %2053 = vrot.lane.b32.xlu2 %v2015_v60, %s3839_s17 }
 0x2ff   :  { %v5419_v5 = vpop.f32.mrf.mxu0 }
 0x300   :  { %2055 = vrot.lane.b32.xlu0 %v2016_v1, %s3839_s17  ;;  %v2017_v24 = vmul.f32 %v1972_v39, %v5419_v5  ;;  %v5447_v37 = vmul.f32 %v2164_v33, %v5419_v5  ;;  %v2179_v39 = vpop.permute.xlu0 %2178  ;;  %v2139_v19 = vpop.permute.xlu1 %2138 }
 0x301   :  { %v2212_v25 = vmul.f32 %v2179_v39, %v5372_v40 }
 0x302   :  { %2071 = vrot.lane.b32.xlu2 %v2024_v4, %s3839_s17  ;;  %2231 = vrot.lane.b32.xlu1 %v2016_v1, %s3838_s4 }
 0x308   :  { %2233 = vrot.lane.b32.xlu0 %v2017_v24, %s3838_s4  ;;  %v2184_v53 = vpop.permute.xlu0 %2183 }
 0x30a   :  { %2327 = vrot.lane.b32.xlu2 %v5426_v18, %s3838_s4  ;;  %2143 = vperm.xlu1 %3834, %v1805_v28   ;;  %v5468_v28 = vmul.f32 %v2129_v41, %v5356_v38 }
 0x310   :  { %2193 = vperm.xlu0 %3833, %v1815_v29   ;;  %v2189_v1 = vpop.permute.xlu0 %2188 }
 0x312   :  { %2331 = vrot.lane.b32.xlu2 %v2210_v32, %s3838_s4  ;;  %2057 = vrot.lane.b32.xlu1 %v2017_v24, %s3839_s17 }
 0x318   :  { %2245 = vrot.lane.b32.xlu0 %v2023_v59, %s3838_s4 }
 0x31a   :  { %2227 = vrot.lane.b32.xlu2 %v2014_v56, %s3838_s4  ;;  %2225 = vrot.lane.b32.xlu1 %v2013_v50, %s3838_s4 }
 0x31c   :  { %v5440_v21 = vpop.permute.xlu2 %2041 }
 0x320   :  { %2313 = vrot.lane.b32.xlu0 %v2201_v35, %s3838_s4 }
 0x322   :  { %2329 = vrot.lane.b32.xlu2 %v5447_v37, %s3838_s4  ;;  %2148 = vperm.xlu1 %3834, %v1806_v36  }
 0x324   :  { %v5452_v45 = vpop.permute.xlu2 %2059 }
 0x328   :  { %2333 = vrot.lane.b32.xlu0 %v2211_v47, %s3838_s4 }
 0x32a   :  { %2198 = vperm.xlu1 %3834, %v1816_v48  }
 0x32c   :  { %v2236_v50 = vpop.permute.xlu2 %2235 }
 0x32d   :  { %v2274_v24 = vadd.f32 %v2236_v50, %v2210_v32  ;;  %v2203_v32 = vmul.f32 %v2134_v20, %v5365_v34 }
 0x32f   :  { %v2290_v42 = vmax.f32 %v2274_v24, 0.0 }
 0x330   :  { %2153 = vperm.xlu0 %3833, %v1807_v51  }
 0x332   :  { %2247 = vrot.lane.b32.xlu1 %v2024_v4, %s3838_s4 }
 0x334   :  { %v2218_v54 = vpop.permute.xlu1 %2217  ;;  %v2238_v56 = vpop.permute.xlu2 %2237 }
 0x335   :  { %v2265_v57 = vadd.f32 %v2218_v54, %v2201_v35  ;;  %v2275_v59 = vadd.f32 %v2238_v56, %v2211_v47  ;;  %v5490_v54 = vmul.f32 %v2184_v53, %v5378_v46  ;;  %v5506_v53 = vmul.f32 %v2139_v19, %v5374_v43 }
 0x336   :  { %v1922_v19 = vmul.f32 %v5341_v16, %v5354_v30  ;;  %v2507_v30 = vld [vmem:[%s5914_s11 + $0x8] sm:$0xff] }
 0x337   :  { %v2281_v62 = vmax.f32 %v2265_v57, 0.0  ;;  %v2291_v63 = vmax.f32 %v2275_v59, 0.0 }
 0x338   :  { %2229 = vrot.lane.b32.xlu0 %v2015_v60, %s3838_s4 }
 0x339   :  { %2425 = vrot.lane.b32.xlu2 %v2281_v62, %s3838_s4 }
 0x33a   :  { %2445 = vrot.lane.b32.xlu1 %v2291_v63, %s3838_s4  ;;  %v5498_v63 = vmul.f32 %v2189_v1, %v5392_v52 }
 0x33c   :  { %v2240_v4 = vpop.permute.xlu2 %2239  ;;  %v2220_v29 = vpop.permute.xlu1 %2219 }
 0x33d   :  { %v2276_v31 = vadd.f32 %v2240_v4, %v2212_v25  ;;  %v5471_v33 = vadd.f32 %v2220_v29, %v5468_v28  ;;  %v5473_v36 = vpop.permute.xlu0 %2043 }
 0x33f   :  { %v2292_v35 = vmax.f32 %v2276_v31, 0.0 }
 0x341   :  { %2443 = vrot.lane.b32.xlu2 %v2290_v42, %s3838_s4  ;;  %2447 = vrot.lane.b32.xlu0 %v2292_v35, %s3838_s4  ;;  %v1920_v42 = vmul.f32 %v5327_v9, %v5408_v61 }
 0x342   :  { %2335 = vrot.lane.b32.xlu1 %v2212_v25, %s3838_s4 }
 0x344   :  { %v5478_v60 = vpop.permute.xlu1 %2045  ;;  %v5480_v41 = vpop.permute.xlu2 %2047 }
 0x345   :  { %v5483_v39 = vpop.permute.xlu0 %2061 }
 0x34a   :  { %2317 = vrot.lane.b32.xlu1 %v2203_v32, %s3838_s4 }
 0x34c   :  { %v2222_v47 = vpop.permute.xlu1 %2221  ;;  %v5486_v48 = vpop.permute.xlu2 %2065 }
 0x34d   :  { %v2267_v50 = vadd.f32 %v2222_v47, %v2203_v32 }
 0x34f   :  { %v2283_v51 = vmax.f32 %v2267_v50, 0.0 }
 0x351   :  { %2429 = vrot.lane.b32.xlu0 %v2283_v51, %s3838_s4 }
 0x352   :  { %v2242_v56 = vpop.permute.xlu0 %2241 }
 0x353   :  { %v2277_v57 = vadd.f32 %v2242_v56, %v5490_v54 }
 0x354   :  { %v5493_v59 = vpop.permute.xlu1 %2063  ;;  %v5495_v20 = vpop.permute.xlu2 %2053 }
 0x355   :  { %5918 = vst [vmem:[#allocation3_spill] sm:$0xff] %v5495_v20  ;;  %v2293_v62 = vmax.f32 %v2277_v57, 0.0 }
 0x357   :  { %2449 = vrot.lane.b32.xlu1 %v2293_v62, %s3838_s4 }
 0x359   :  { %2339 = vrot.lane.b32.xlu0 %v5498_v63, %s3838_s4 }
 0x35a   :  { %v5503_v24 = vpop.permute.xlu0 %2049 }
 0x35c   :  { %v2224_v25 = vpop.permute.xlu1 %2223  ;;  %v5508_v4 = vpop.permute.xlu2 %2071 }
 0x35d   :  { %v2268_v29 = vadd.f32 %v2224_v25, %v5506_v53 }
 0x35f   :  { %v2284_v31 = vmax.f32 %v2268_v29, 0.0 }
 0x361   :  { %2431 = vrot.lane.b32.xlu1 %v2284_v31, %s3838_s4 }
 0x362   :  { %v5512_v1 = vpop.permute.xlu0 %2067 }
 0x364   :  { %v5516_v35 = vpop.permute.xlu1 %2051  ;;  %v2328_v32 = vpop.permute.xlu2 %2327 }
 0x365   :  { %v2368_v47 = vadd.f32 %v2328_v32, %v1920_v42  ;;  %v2508_v32 = vld [vmem:[%s5914_s11 + $0x10] sm:$0xff] }
 0x366   :  { %2571 = vmatpush.msrb.mxu1 %v2508_v32  ;;  %3827 = vmatpush.msra.mxu2 %v2508_v32 }
 0x368   :  { %2572 = vmatpush.msrb.mxu1 %v2507_v30  ;;  %3828 = vmatpush.msra.mxu2 %v2507_v30 }
 0x36a   :  { %v5518_v50 = vpop.permute.xlu0 %2243 }
 0x36c   :  { %v5522_v51 = vpop.permute.xlu1 %2069  ;;  %v2332_v56 = vpop.permute.xlu2 %2331 }
 0x36d   :  { %v2370_v57 = vadd.f32 %v2332_v56, %v1922_v19 }
 0x372   :  { %v2056_v62 = vpop.permute.xlu0 %2055 }
 0x373   :  { %v5524_v25 = vadd.f32 %v2056_v62, %v1920_v42  ;;  %v5526_v29 = vadd.f32 %v2368_v47, %v2056_v62  ;;  %v2506_v42 = vld [vmem:[%s5914_s11] sm:$0xff]  ;;  %v1921_v47 = vmul.f32 %v5331_v11, %v5419_v5 }
 0x374   :  { %v2228_v31 = vpop.permute.xlu2 %2227  ;;  %v2232_v9 = vpop.permute.xlu1 %2231  ;;  %2573 = vmatpush.msrb.mxu1 %v2506_v42  ;;  %3829 = vmatpush.msra.mxu2 %v2506_v42 }
 0x375   :  { %v2272_v61 = vadd.f32 %v2232_v9, %v5426_v18 }
 0x377   :  { %v2288_v16 = vmax.f32 %v2272_v61, 0.0 }
 0x379   :  { %2439 = vrot.lane.b32.xlu2 %v2288_v16, %s3838_s4 }
 0x37a   :  { %v2234_v18 = vpop.permute.xlu0 %2233 }
 0x37b   :  { %v2273_v56 = vadd.f32 %v2234_v18, %v5447_v37 }
 0x37c   :  { %v2144_v62 = vpop.permute.xlu1 %2143  ;;  %v2330_v9 = vpop.permute.xlu2 %2329 }
 0x37d   :  { %v5543_v61 = vmul.f32 %v2144_v62, %v5381_v49  ;;  %v2369_v32 = vadd.f32 %v2330_v9, %v1921_v47  ;;  %v2289_v30 = vmax.f32 %v2273_v56, 0.0  ;;  %v2282_v62 = vmax.f32 %v5471_v33, 0.0 }
 0x37e   :  { %v1913_v9 = vmul.f32 %v5323_v7, %v5349_v44  ;;  %v2098_v33 = vadd.f32 %v5452_v45, %v1922_v19 }
 0x37f   :  { %2321 = vrot.lane.b32.xlu0 %v5543_v61, %s3838_s4 }
 0x380   :  { %v2114_v19 = vmax.f32 %v2098_v33, 0.0 }
 0x381   :  { %2441 = vrot.lane.b32.xlu2 %v2289_v30, %s3838_s4 }
 0x382   :  { %v2194_v16 = vpop.permute.xlu0 %2193 }
 0x383   :  { %v2215_v42 = vmul.f32 %v2194_v16, %v5403_v58 }
 0x384   :  { %v2058_v20 = vpop.permute.xlu1 %2057 }
 0x385   :  { %v5549_v13 = vadd.f32 %v2058_v20, %v1921_v47  ;;  %v5551_v11 = vadd.f32 %v2369_v32, %v2058_v20  ;;  %2341 = vrot.lane.b32.xlu1 %v2215_v42, %s3838_s4  ;;  %v2089_v20 = vadd.f32 %v5440_v21, %v1913_v9 }
 0x389   :  { %2315 = vrot.lane.b32.xlu2 %v5468_v28, %s3838_s4 }
 0x38a   :  { %v2246_v5 = vpop.permute.xlu0 %2245 }
 0x38b   :  { %v2279_v37 = vadd.f32 %v2246_v5, %v2215_v42  ;;  %v2105_v5 = vmax.f32 %v2089_v20, 0.0 }
 0x38c   :  { %v2226_v18 = vpop.permute.xlu1 %2225 }
 0x38d   :  { %v2295_v56 = vmax.f32 %v2279_v37, 0.0  ;;  %v2386_v37 = vadd.f32 %v2370_v57, %v5452_v45 }
 0x38f   :  { %2453 = vrot.lane.b32.xlu0 %v2295_v56, %s3838_s4  ;;  %v2402_v57 = vmax.f32 %v2386_v37, 0.0 }
 0x391   :  { %2427 = vrot.lane.b32.xlu2 %v2282_v62, %s3838_s4  ;;  %v1923_v62 = vmul.f32 %v5333_v12, %v5363_v26 }
 0x392   :  { %v2314_v47 = vpop.permute.xlu0 %2313 }
 0x393   :  { %v2361_v32 = vadd.f32 %v2314_v47, %v1913_v9  ;;  %v2426_v30 = vpop.permute.xlu2 %2425 }
 0x394   :  { %v2149_v16 = vpop.permute.xlu1 %2148  ;;  %v2473_v44 = vsel %vm1671_vm2, %v2105_v5, %v2426_v30 }
 0x395   :  { %v2377_v28 = vadd.f32 %v2361_v32, %v5440_v21  ;;  %v2206_v42 = vmul.f32 %v2149_v16, %v5388_v22 }
 0x397   :  { %v2393_v56 = vmax.f32 %v2377_v28, 0.0  ;;  %v2270_v7 = vadd.f32 %v2228_v31, %v2206_v42  ;;  %2323 = vrot.lane.b32.xlu1 %v2206_v42, %s3838_s4  ;;  %v2099_v42 = vadd.f32 %v5483_v39, %v1923_v62 }
 0x399   :  { %v2490_v21 = vsel %vm2489_vm3, %v2473_v44, %v2393_v56  ;;  %v2286_v9 = vmax.f32 %v2270_v7, 0.0  ;;  %2337 = vrot.lane.b32.xlu2 %v5490_v54, %s3838_s4  ;;  %v2278_v54 = vadd.f32 %v5518_v50, %v5498_v63  ;;  %v2115_v7 = vmax.f32 %v2099_v42, 0.0 }
 0x39a   :  { %3614 = vmatmul.msk.f32.vlgmr.msrb.gmra.mxu1 %vm2509_vm4, %v2490_v21  ;;  %v2334_v45 = vpop.permute.xlu0 %2333  ;;  %v2269_v63 = vadd.f32 %v2226_v18, %v5543_v61  ;;  %v2400_v61 = vmax.f32 %v5526_v29, 0.0 }
 0x39b   :  { %v2371_v31 = vadd.f32 %v2334_v45, %v1923_v62  ;;  %v2444_v20 = vpop.permute.xlu2 %2443  ;;  %2435 = vrot.lane.b32.xlu0 %v2286_v9, %s3838_s4  ;;  %v2294_v5 = vmax.f32 %v2278_v54, 0.0 }
 0x39c   :  { %v2482_v47 = vsel %vm1671_vm2, %v2114_v19, %v2444_v20  ;;  %v2199_v32 = vpop.permute.xlu1 %2198  ;;  %v2285_v45 = vmax.f32 %v2269_v63, 0.0  ;;  %v2113_v20 = vmax.f32 %v5549_v13, 0.0  ;;  %v1924_v13 = vmul.f32 %v5337_v14, %v5372_v40 }
 0x39d   :  { %v2499_v12 = vsel %vm2489_vm3, %v2482_v47, %v2402_v57  ;;  %v2216_v30 = vmul.f32 %v2199_v32, %v5412_v0  ;;  %v2387_v37 = vadd.f32 %v2371_v31, %v5483_v39  ;;  %v2112_v39 = vmax.f32 %v5524_v25, 0.0 }
 0x39e   :  { %v2401_v47 = vmax.f32 %v5551_v11, 0.0  ;;  %v1914_v25 = vmul.f32 %v5329_v10, %v5356_v38  ;;  %v2100_v40 = vadd.f32 %v5493_v59, %v1924_v13 }
 0x39f   :  { %v2403_v44 = vmax.f32 %v2387_v37, 0.0 }
 0x3a0   :  { %v2090_v42 = vadd.f32 %v5473_v36, %v1914_v25 }
 0x3a1   :  { %2319 = vrot.lane.b32.xlu2 %v5506_v53, %s3838_s4 }
 0x3a2   :  { %v2154_v26 = vpop.permute.xlu0 %2153 }
 0x3a3   :  { %v2207_v56 = vmul.f32 %v2154_v26, %v5397_v55 }
 0x3a4   :  { %v2248_v16 = vpop.permute.xlu1 %2247 }
 0x3a5   :  { %v2280_v28 = vadd.f32 %v2248_v16, %v2216_v30 }
 0x3a7   :  { %v2296_v33 = vmax.f32 %v2280_v28, 0.0 }
 0x3a9   :  { %2451 = vrot.lane.b32.xlu2 %v2294_v5, %s3838_s4  ;;  %2455 = vrot.lane.b32.xlu1 %v2296_v33, %s3838_s4  ;;  %v1915_v33 = vmul.f32 %v5309_v2, %v5365_v34 }
 0x3aa   :  { %v2230_v53 = vpop.permute.xlu0 %2229 }
 0x3ab   :  { %v2271_v50 = vadd.f32 %v2230_v53, %v2207_v56 }
 0x3ac   :  { %v2446_v21 = vpop.permute.xlu1 %2445 }
 0x3ad   :  { %v2287_v9 = vmax.f32 %v2271_v50, 0.0  ;;  %v2483_v62 = vsel %vm1671_vm2, %v2115_v7, %v2446_v21  ;;  %v2091_v7 = vadd.f32 %v5478_v60, %v1915_v33  ;;  %v1925_v21 = vmul.f32 %v5345_v23, %v5378_v46 }
 0x3ae   :  { %v2500_v19 = vsel %vm2489_vm3, %v2483_v62, %v2403_v44 }
 0x3af   :  { %2437 = vrot.lane.b32.xlu0 %v2287_v9, %s3838_s4  ;;  %v2107_v34 = vmax.f32 %v2091_v7, 0.0  ;;  %v2116_v9 = vmax.f32 %v2100_v40, 0.0 }
 0x3b1   :  { %2433 = vrot.lane.b32.xlu2 %v2285_v45, %s3838_s4 }
 0x3b3   :  { %v2448_v28 = vpop.permute.xlu0 %2447 }
 0x3b9   :  { %2343 = vrot.lane.b32.xlu2 %v2216_v30, %s3838_s4  ;;  %v2336_v30 = vpop.permute.xlu1 %2335 }
 0x3ba   :  { %v2372_v37 = vadd.f32 %v2336_v30, %v1924_v13  ;;  %v1917_v13 = vmul.f32 %v5318_v6, %v5381_v49 }
 0x3bc   :  { %v2093_v49 = vadd.f32 %v5503_v24, %v1917_v13 }
 0x3c1   :  { %2325 = vrot.lane.b32.xlu2 %v2207_v56, %s3838_s4  ;;  %v2318_v5 = vpop.permute.xlu1 %2317  ;;  %v2106_v56 = vmax.f32 %v2090_v42, 0.0 }
 0x3c2   :  { %v2363_v53 = vadd.f32 %v2318_v5, %v1915_v33 }
 0x3c3   :  { %v2430_v50 = vpop.permute.xlu0 %2429 }
 0x3c4   :  { %v2379_v2 = vadd.f32 %v2363_v53, %v5478_v60  ;;  %v2475_v62 = vsel %vm1671_vm2, %v2107_v34, %v2430_v50  ;;  %v2101_v60 = vadd.f32 %v5486_v48, %v1925_v21 }
 0x3c6   :  { %v2395_v45 = vmax.f32 %v2379_v2, 0.0 }
 0x3cb   :  { %v2340_v23 = vpop.permute.xlu0 %2339 }
 0x3d3   :  { %v2440_v18 = vpop.permute.xlu2 %2439 }
 0x3d4   :  { %v2480_v57 = vsel %vm1671_vm2, %v2112_v39, %v2440_v18  ;;  %v2492_v18 = vsel %vm2489_vm3, %v2475_v62, %v2395_v45 }
 0x3d5   :  { %v2497_v31 = vsel %vm2489_vm3, %v2480_v57, %v2400_v61  ;;  %v2484_v61 = vsel %vm1671_vm2, %v2116_v9, %v2448_v28 }
 0x3d6   :  { %3621 = vmatmul.msk.f32.vlgmr.msra.gmra.mxu2 %vm2509_vm4, %v2497_v31  ;;  %v1916_v31 = vmul.f32 %v5320_v3, %v5374_v43 }
 0x3db   :  { %v2442_v32 = vpop.permute.xlu2 %2441 }
 0x3dc   :  { %v2481_v26 = vsel %vm1671_vm2, %v2113_v20, %v2442_v32  ;;  %v1926_v20 = vmul.f32 %v5339_v15, %v5392_v52  ;;  %v2117_v32 = vmax.f32 %v2101_v60, 0.0 }
 0x3dd   :  { %v2498_v54 = vsel %vm2489_vm3, %v2481_v26, %v2401_v47  ;;  %v2092_v26 = vadd.f32 %v5480_v41, %v1916_v31 }
 0x3de   :  { %3622 = vmatmul.msk.f32.gmra.mxu2 %vm2509_vm4, %v2498_v54  ;;  %v2374_v54 = vadd.f32 %v2340_v23, %v1926_v20 }
 0x3df   :  { %v2108_v3 = vmax.f32 %v2092_v26, 0.0 }
 0x3e0   :  { %v2390_v15 = vadd.f32 %v2374_v54, %v5512_v1 }
 0x3e3   :  { %v2316_v29 = vpop.permute.xlu2 %2315 }
 0x3e4   :  { %v2362_v16 = vadd.f32 %v2316_v29, %v1914_v25 }
 0x3e6   :  { %3623 = vmatmul.msk.f32.gmra.mxu2 %vm2509_vm4, %v2499_v12  ;;  %v2378_v11 = vadd.f32 %v2362_v16, %v5473_v36  ;;  %v2388_v12 = vadd.f32 %v2372_v37, %v5493_v59  ;;  %v2450_v36 = vpop.permute.xlu1 %2449  ;;  %v2102_v16 = vadd.f32 %v5512_v1, %v1926_v20 }
 0x3e8   :  { %v2394_v10 = vmax.f32 %v2378_v11, 0.0  ;;  %v2404_v44 = vmax.f32 %v2388_v12, 0.0  ;;  %v1927_v11 = vmul.f32 %v5343_v17, %v5403_v58  ;;  %v2118_v33 = vmax.f32 %v2102_v16, 0.0 }
 0x3ea   :  { %v2103_v1 = vadd.f32 %v5522_v51, %v1927_v11 }
 0x3eb   :  { %v2428_v38 = vpop.permute.xlu2 %2427 }
 0x3ec   :  { %v2474_v63 = vsel %vm1671_vm2, %v2106_v56, %v2428_v38  ;;  %v2119_v12 = vmax.f32 %v2103_v1, 0.0 }
 0x3ed   :  { %v2491_v14 = vsel %vm2489_vm3, %v2474_v63, %v2394_v10  ;;  %v1918_v63 = vmul.f32 %v5325_v8, %v5388_v22 }
 0x3ee   :  { %3615 = vmatmul.msk.f32.gmra.mxu1 %vm2509_vm4, %v2491_v14  ;;  %3624 = vmatmul.msk.f32.gmra.mxu2 %vm2509_vm4, %v2500_v19  ;;  %v2501_v19 = vsel %vm2489_vm3, %v2484_v61, %v2404_v44  ;;  %v2432_v46 = vpop.permute.xlu1 %2431  ;;  %v2109_v14 = vmax.f32 %v2093_v49, 0.0 }
 0x3ef   :  { %v2476_v5 = vsel %vm1671_vm2, %v2108_v3, %v2432_v46  ;;  %v5919_v46 = vld [vmem:[#allocation2_spill] sm:$0xff] }
 0x3f1   :  { %v2322_v43 = vpop.permute.xlu0 %2321 }
 0x3f2   :  { %v2365_v56 = vadd.f32 %v2322_v43, %v1917_v13 }
 0x3f3   :  { %v2338_v39 = vpop.permute.xlu2 %2337 }
 0x3f4   :  { %v2373_v59 = vadd.f32 %v2338_v39, %v1925_v21  ;;  %v2381_v17 = vadd.f32 %v2365_v56, %v5503_v24  ;;  %v2094_v21 = vadd.f32 %v5516_v35, %v1918_v63  ;;  %v1928_v39 = vmul.f32 %v5347_v27, %v5412_v0 }
 0x3f6   :  { %v2389_v57 = vadd.f32 %v2373_v59, %v5486_v48  ;;  %3616 = vmatmul.msk.f32.gmra.mxu1 %vm2509_vm4, %v2492_v18  ;;  %3625 = vmatmul.msk.f32.gmra.mxu2 %vm2509_vm4, %v2501_v19  ;;  %v2485_v48 = vsel %vm1671_vm2, %v2117_v32, %v2450_v36  ;;  %v2397_v34 = vmax.f32 %v2381_v17, 0.0  ;;  %v2110_v22 = vmax.f32 %v2094_v21, 0.0  ;;  %v5920_v32 = vld [vmem:[#allocation3_spill] sm:$0xff] }
 0x3f7   :  { %v2342_v52 = vpop.permute.xlu1 %2341  ;;  %v2104_v19 = vadd.f32 %v5508_v4, %v1928_v39 }
 0x3f8   :  { %v2405_v47 = vmax.f32 %v2389_v57, 0.0  ;;  %v2375_v53 = vadd.f32 %v2342_v52, %v1927_v11 }
 0x3f9   :  { %v2120_v27 = vmax.f32 %v2104_v19, 0.0 }
 0x3fa   :  { %v2502_v29 = vsel %vm2489_vm3, %v2485_v48, %v2405_v47  ;;  %v2391_v58 = vadd.f32 %v2375_v53, %v5522_v51 }
 0x3fb   :  { %v2320_v30 = vpop.permute.xlu2 %2319 }
 0x3fc   :  { %v2364_v25 = vadd.f32 %v2320_v30, %v1916_v31  ;;  %v2407_v36 = vmax.f32 %v2391_v58, 0.0  ;;  %v1919_v31 = vmul.f32 %v5919_v46, %v5397_v55 }
 0x3fe   :  { %v2380_v28 = vadd.f32 %v2364_v25, %v5480_v41  ;;  %3626 = vmatmul.msk.f32.gmra.mxu2 %vm2509_vm4, %v2502_v29  ;;  %v2406_v41 = vmax.f32 %v2390_v15, 0.0  ;;  %v2095_v26 = vadd.f32 %v5920_v32, %v1919_v31 }
 0x400   :  { %v2396_v42 = vmax.f32 %v2380_v28, 0.0  ;;  %v2111_v25 = vmax.f32 %v2095_v26, 0.0 }
 0x401   :  { %v2454_v7 = vpop.permute.xlu0 %2453 }
 0x402   :  { %v2493_v37 = vsel %vm2489_vm3, %v2476_v5, %v2396_v42  ;;  %v2487_v40 = vsel %vm1671_vm2, %v2119_v12, %v2454_v7 }
 0x403   :  { %v2452_v10 = vpop.permute.xlu2 %2451  ;;  %3617 = vmatmul.msk.f32.gmra.mxu1 %vm2509_vm4, %v2493_v37  ;;  %v2504_v62 = vsel %vm2489_vm3, %v2487_v40, %v2407_v36 }
 0x404   :  { %v2486_v38 = vsel %vm1671_vm2, %v2118_v33, %v2452_v10 }
 0x405   :  { %v2503_v6 = vsel %vm2489_vm3, %v2486_v38, %v2406_v41 }
 0x406   :  { %3627 = vmatmul.msk.f32.gmra.mxu2 %vm2509_vm4, %v2503_v6 }
 0x409   :  { %v2324_v50 = vpop.permute.xlu1 %2323 }
 0x40a   :  { %v2366_v2 = vadd.f32 %v2324_v50, %v1918_v63 }
 0x40b   :  { %v2434_v44 = vpop.permute.xlu2 %2433 }
 0x40c   :  { %v2477_v9 = vsel %vm1671_vm2, %v2109_v14, %v2434_v44  ;;  %v2382_v24 = vadd.f32 %v2366_v2, %v5516_v35 }
 0x40d   :  { %v2494_v51 = vsel %vm2489_vm3, %v2477_v9, %v2397_v34  ;;  %v2436_v8 = vpop.permute.xlu0 %2435 }
 0x40e   :  { %3618 = vmatmul.msk.f32.gmra.mxu1 %vm2509_vm4, %v2494_v51  ;;  %3628 = vmatmul.msk.f32.gmra.mxu2 %vm2509_vm4, %v2504_v62  ;;  %v2398_v45 = vmax.f32 %v2382_v24, 0.0  ;;  %v2478_v61 = vsel %vm1671_vm2, %v2110_v22, %v2436_v8 }
 0x410   :  { %v2495_v35 = vsel %vm2489_vm3, %v2478_v61, %v2398_v45 }
 0x413   :  { %v2344_v59 = vpop.permute.xlu2 %2343 }
 0x414   :  { %v2376_v18 = vadd.f32 %v2344_v59, %v1928_v39 }
 0x416   :  { %3619 = vmatmul.msk.f32.gmra.mxu1 %vm2509_vm4, %v2495_v35  ;;  %v2392_v60 = vadd.f32 %v2376_v18, %v5508_v4 }
 0x417   :  { %v2575_v57 = vpop.f32.mrf.mxu1 }
 0x418   :  { %v2623_v23 = vsel %vm1671_vm2, %v2575_v57, inf  ;;  %v2408_v0 = vmax.f32 %v2392_v60, 0.0  ;;  %v2672_v55 = vsel %vm2671_vm5, %v2575_v57, inf }
 0x419   :  { %2624 = vmin.xlane.f32.xlu1 %v2623_v23 }
 0x41b   :  { %v2326_v20 = vpop.permute.xlu2 %2325  ;;  %v2456_v47 = vpop.permute.xlu1 %2455 }
 0x41c   :  { %v2367_v54 = vadd.f32 %v2326_v20, %v1919_v31  ;;  %v2488_v30 = vsel %vm1671_vm2, %v2120_v27, %v2456_v47 }
 0x41d   :  { %v2505_v48 = vsel %vm2489_vm3, %v2488_v30, %v2408_v0 }
 0x41e   :  { %v2383_v4 = vadd.f32 %v2367_v54, %v5920_v32  ;;  %3629 = vmatmul.msk.f32.gmra.mxu2 %vm2509_vm4, %v2505_v48 }
 0x420   :  { %v2399_v29 = vmax.f32 %v2383_v4, 0.0 }
 0x421   :  { %v2438_v16 = vpop.permute.xlu0 %2437  ;;  %2673 = vmin.xlane.f32.xlu1 %v2672_v55 }
 0x422   :  { %v2479_v28 = vsel %vm1671_vm2, %v2111_v25, %v2438_v16 }
 0x423   :  { %v2496_v3 = vsel %vm2489_vm3, %v2479_v28, %v2399_v29 }
 0x424   :  { %3620 = vmatmul.msk.f32.gmra.mxu1 %vm2509_vm4, %v2496_v3 }
 0x459   :  { %v5689_v52 = vpop.f32.mrf.mxu2 }
 0x45a   :  { %v2693_v34 = vsel %vm2671_vm5, %v5689_v52, inf  ;;  %v2644_v51 = vsel %vm1671_vm2, %v5689_v52, inf }
 0x461   :  { %v5699_v33 = vpop.f32.mrf.mxu2 }
 0x462   :  { %v2647_v9 = vsel %vm1671_vm2, %v5699_v33, inf  ;;  %v2696_v62 = vsel %vm2671_vm5, %v5699_v33, inf }
 0x469   :  { %v5707_v53 = vpop.f32.mrf.mxu2 }
 0x46a   :  { %v2699_v45 = vsel %vm2671_vm5, %v5707_v53, inf  ;;  %v2650_v39 = vsel %vm1671_vm2, %v5707_v53, inf }
 0x46b   :  { %v5685_v15 = vpop.f32.mrf.mxu1 }
 0x46c   :  { %v2626_v43 = vsel %vm1671_vm2, %v5685_v15, inf  ;;  %v2675_v13 = vsel %vm2671_vm5, %v5685_v15, inf }
 0x46d   :  { %2627 = vmin.xlane.f32.xlu2 %v2626_v43 }
 0x471   :  { %v5715_v49 = vpop.f32.mrf.mxu2 }
 0x472   :  { %v2702_v8 = vsel %vm2671_vm5, %v5715_v49, inf  ;;  %v2653_v18 = vsel %vm1671_vm2, %v5715_v49, inf }
 0x473   :  { %v5691_v42 = vpop.f32.mrf.mxu1 }
 0x474   :  { %v2629_v11 = vsel %vm1671_vm2, %v5691_v42, inf  ;;  %v2678_v5 = vsel %vm2671_vm5, %v5691_v42, inf }
 0x475   :  { %2676 = vmin.xlane.f32.xlu2 %v2675_v13  ;;  %2630 = vmin.xlane.f32.xlu0 %v2629_v11 }
 0x479   :  { %v5730_v2 = vpop.f32.mrf.mxu2 }
 0x47a   :  { %v2656_v61 = vsel %vm1671_vm2, %v5730_v2, inf  ;;  %v2705_v35 = vsel %vm2671_vm5, %v5730_v2, inf }
 0x47d   :  { %2679 = vmin.xlane.f32.xlu0 %v2678_v5 }
 0x480   :  { %v5701_v37 = vpop.f32.mrf.mxu1 }
 0x481   :  { %v2681_v41 = vsel %vm2671_vm5, %v5701_v37, inf  ;;  %v2632_v56 = vsel %vm1671_vm2, %v5701_v37, inf  ;;  %v5742_v24 = vpop.f32.mrf.mxu2 }
 0x482   :  { %2682 = vmin.xlane.f32.xlu1 %v2681_v41  ;;  %2633 = vmin.xlane.f32.xlu2 %v2632_v56  ;;  %v2708_v60 = vsel %vm2671_vm5, %v5742_v24, inf }
 0x489   :  { %v5750_v22 = vpop.f32.mrf.mxu2 }
 0x48a   :  { %v2711_v23 = vsel %vm2671_vm5, %v5750_v22, inf  ;;  %v2662_v31 = vsel %vm1671_vm2, %v5750_v22, inf }
 0x48b   :  { %v5709_v10 = vpop.f32.mrf.mxu1 }
 0x48c   :  { %v2625_v1 = vpop.xlane.xlu1 %2624  ;;  %v2684_v38 = vsel %vm2671_vm5, %v5709_v10, inf  ;;  %v2635_v6 = vsel %vm1671_vm2, %v5709_v10, inf }
 0x48d   :  { %2685 = vmin.xlane.f32.xlu2 %v2684_v38  ;;  %2636 = vmin.xlane.f32.xlu1 %v2635_v6 }
 0x491   :  { %v5758_v59 = vpop.f32.mrf.mxu2 }
 0x492   :  { %v2665_v19 = vsel %vm1671_vm2, %v5758_v59, inf  ;;  %v2714_v20 = vsel %vm2671_vm5, %v5758_v59, inf }
 0x493   :  { %v5717_v17 = vpop.f32.mrf.mxu1 }
 0x494   :  { %v2674_v58 = vpop.xlane.xlu1 %2673  ;;  %v2687_v7 = vsel %vm2671_vm5, %v5717_v17, inf  ;;  %v2638_v63 = vsel %vm1671_vm2, %v5717_v17, inf }
 0x495   :  { %v2720_v12 = vmin.f32 %v2625_v1, %v2674_v58  ;;  %2688 = vmin.xlane.f32.xlu0 %v2687_v7  ;;  %2639 = vmin.xlane.f32.xlu2 %v2638_v63 }
 0x497   :  { %v2736_v50 = vsel %vm2489_vm3, %v2575_v57, %v2720_v12  ;;  %v2659_v57 = vsel %vm1671_vm2, %v5742_v24, inf }
 0x498   :  { %v2753_v14 = vsel %vm2752_vm6, %v2736_v50, %v2625_v1 }
 0x499   :  { %v2770_v40 = vsel %vm2769_vm7, %v2753_v14, %v2674_v58 }
 0x49a   :  { %2787 = vst.msk [vmem:[%s5915_s13] sm:$0xff] %vm2786_vm8, %v2770_v40 }
 0x49d   :  { %2694 = vmin.xlane.f32.xlu2 %v2693_v34 }
 0x4a1   :  { %v5734_v36 = vpop.f32.mrf.mxu1  ;;  %v5772_v46 = vpop.f32.mrf.mxu2 }
 0x4a2   :  { %v2690_v44 = vsel %vm2671_vm5, %v5734_v36, inf  ;;  %v2641_v21 = vsel %vm1671_vm2, %v5734_v36, inf  ;;  %v2668_v27 = vsel %vm1671_vm2, %v5772_v46, inf  ;;  %v2717_v0 = vsel %vm2671_vm5, %v5772_v46, inf }
 0x4a3   :  { %2691 = vmin.xlane.f32.xlu1 %v2690_v44  ;;  %2642 = vmin.xlane.f32.xlu0 %v2641_v21 }
 0x4a5   :  { %2648 = vmin.xlane.f32.xlu2 %v2647_v9 }
 0x4ab   :  { %2645 = vmin.xlane.f32.xlu1 %v2644_v51  ;;  %2697 = vmin.xlane.f32.xlu0 %v2696_v62 }
 0x4ad   :  { %2703 = vmin.xlane.f32.xlu2 %v2702_v8 }
 0x4b3   :  { %2700 = vmin.xlane.f32.xlu1 %v2699_v45  ;;  %2651 = vmin.xlane.f32.xlu0 %v2650_v39 }
 0x4b5   :  { %2657 = vmin.xlane.f32.xlu2 %v2656_v61 }
 0x4bb   :  { %2654 = vmin.xlane.f32.xlu1 %v2653_v18  ;;  %2706 = vmin.xlane.f32.xlu0 %v2705_v35 }
 0x4bd   :  { %2666 = vmin.xlane.f32.xlu2 %v2665_v19 }
 0x4c3   :  { %2709 = vmin.xlane.f32.xlu1 %v2708_v60  ;;  %2660 = vmin.xlane.f32.xlu0 %v2659_v57 }
 0x4c5   :  { %2712 = vmin.xlane.f32.xlu2 %v2711_v23 }
 0x4cb   :  { %2663 = vmin.xlane.f32.xlu1 %v2662_v31  ;;  %2669 = vmin.xlane.f32.xlu0 %v2668_v27 }
 0x4d3   :  { %2718 = vmin.xlane.f32.xlu1 %v2717_v0  ;;  %2715 = vmin.xlane.f32.xlu0 %v2714_v20 }
 0x4e0   :  { %v2628_v47 = vpop.xlane.xlu2 %2627 }
 0x4e8   :  { %v2677_v32 = vpop.xlane.xlu2 %2676  ;;  %v2631_v26 = vpop.xlane.xlu0 %2630 }
 0x4e9   :  { %v2721_v54 = vmin.f32 %v2628_v47, %v2677_v32 }
 0x4eb   :  { %v2737_v30 = vsel %vm2489_vm3, %v5685_v15, %v2721_v54 }
 0x4ec   :  { %v2754_v48 = vsel %vm2752_vm6, %v2737_v30, %v2628_v47 }
 0x4ed   :  { %v2771_v4 = vsel %vm2769_vm7, %v2754_v48, %v2677_v32 }
 0x4ee   :  { %2788 = vst.msk [vmem:[%s5915_s13 + $0x8] sm:$0xff] %vm2786_vm8, %v2771_v4 }
 0x4f0   :  { %v2680_v25 = vpop.xlane.xlu0 %2679 }
 0x4f1   :  { %v2722_v29 = vmin.f32 %v2631_v26, %v2680_v25 }
 0x4f3   :  { %v2738_v55 = vsel %vm2489_vm3, %v5691_v42, %v2722_v29 }
 0x4f4   :  { %v2755_v16 = vsel %vm2752_vm6, %v2738_v55, %v2631_v26 }
 0x4f5   :  { %v2772_v28 = vsel %vm2769_vm7, %v2755_v16, %v2680_v25  ;;  %v2634_v3 = vpop.xlane.xlu2 %2633  ;;  %v2683_v15 = vpop.xlane.xlu1 %2682 }
 0x4f6   :  { %2789 = vst.msk [vmem:[%s5915_s13 + $0x10] sm:$0xff] %vm2786_vm8, %v2772_v28  ;;  %v2723_v43 = vmin.f32 %v2634_v3, %v2683_v15 }
 0x4f8   :  { %v2739_v13 = vsel %vm2489_vm3, %v5701_v37, %v2723_v43 }
 0x4f9   :  { %v2756_v11 = vsel %vm2752_vm6, %v2739_v13, %v2634_v3 }
 0x4fa   :  { %v2773_v5 = vsel %vm2769_vm7, %v2756_v11, %v2683_v15 }
 0x4fb   :  { %2790 = vst.msk [vmem:[%s5915_s13 + $0x18] sm:$0xff] %vm2786_vm8, %v2773_v5 }
 0x500   :  { %v2686_v42 = vpop.xlane.xlu2 %2685  ;;  %v2637_v41 = vpop.xlane.xlu1 %2636 }
 0x501   :  { %v2724_v56 = vmin.f32 %v2637_v41, %v2686_v42 }
 0x503   :  { %v2740_v1 = vsel %vm2489_vm3, %v5709_v10, %v2724_v56 }
 0x504   :  { %v2757_v38 = vsel %vm2752_vm6, %v2740_v1, %v2637_v41 }
 0x505   :  { %v2774_v6 = vsel %vm2769_vm7, %v2757_v38, %v2686_v42 }
 0x506   :  { %2791 = vst.msk [vmem:[%s5915_s13 + $0x20] sm:$0xff] %vm2786_vm8, %v2774_v6 }
 0x508   :  { %v2689_v37 = vpop.xlane.xlu0 %2688  ;;  %v2640_v58 = vpop.xlane.xlu2 %2639 }
 0x509   :  { %v2725_v7 = vmin.f32 %v2640_v58, %v2689_v37 }
 0x50b   :  { %v2741_v63 = vsel %vm2489_vm3, %v5717_v17, %v2725_v7 }
 0x50c   :  { %v2758_v12 = vsel %vm2752_vm6, %v2741_v63, %v2640_v58 }
 0x50d   :  { %v2775_v50 = vsel %vm2769_vm7, %v2758_v12, %v2689_v37 }
 0x50e   :  { %2792 = vst.msk [vmem:[%s5915_s13 + $0x28] sm:$0xff] %vm2786_vm8, %v2775_v50 }
 0x510   :  { %v2695_v10 = vpop.xlane.xlu2 %2694 }
 0x516   :  { %v2643_v14 = vpop.xlane.xlu0 %2642  ;;  %v2692_v40 = vpop.xlane.xlu1 %2691 }
 0x517   :  { %v2726_v34 = vmin.f32 %v2643_v14, %v2692_v40 }
 0x518   :  { %v2649_v44 = vpop.xlane.xlu2 %2648 }
 0x519   :  { %v2742_v21 = vsel %vm2489_vm3, %v5734_v36, %v2726_v34 }
 0x51a   :  { %v2759_v9 = vsel %vm2752_vm6, %v2742_v21, %v2643_v14 }
 0x51b   :  { %v2776_v17 = vsel %vm2769_vm7, %v2759_v9, %v2692_v40 }
 0x51c   :  { %2793 = vst.msk [vmem:[%s5915_s13 + $0x30] sm:$0xff] %vm2786_vm8, %v2776_v17 }
 0x51e   :  { %v2646_v51 = vpop.xlane.xlu1 %2645  ;;  %v2698_v62 = vpop.xlane.xlu0 %2697 }
 0x51f   :  { %v2727_v8 = vmin.f32 %v2646_v51, %v2695_v10  ;;  %v2728_v45 = vmin.f32 %v2649_v44, %v2698_v62 }
 0x520   :  { %v2704_v39 = vpop.xlane.xlu2 %2703 }
 0x521   :  { %v2743_v61 = vsel %vm2489_vm3, %v5689_v52, %v2727_v8  ;;  %v2744_v36 = vsel %vm2489_vm3, %v5699_v33, %v2728_v45 }
 0x522   :  { %v2760_v18 = vsel %vm2752_vm6, %v2743_v61, %v2646_v51  ;;  %v2761_v35 = vsel %vm2752_vm6, %v2744_v36, %v2649_v44 }
 0x523   :  { %v2777_v19 = vsel %vm2769_vm7, %v2760_v18, %v2695_v10  ;;  %v2778_v60 = vsel %vm2769_vm7, %v2761_v35, %v2698_v62 }
 0x524   :  { %2794 = vst.msk [vmem:[%s5915_s13 + $0x38] sm:$0xff] %vm2786_vm8, %v2777_v19 }
 0x525   :  { %2795 = vst.msk [vmem:[%s5915_s13 + $0x40] sm:$0xff] %vm2786_vm8, %v2778_v60 }
 0x526   :  { %v2701_v52 = vpop.xlane.xlu1 %2700  ;;  %v2652_v33 = vpop.xlane.xlu0 %2651 }
 0x527   :  { %v2729_v57 = vmin.f32 %v2652_v33, %v2701_v52 }
 0x528   :  { %v2658_v31 = vpop.xlane.xlu2 %2657 }
 0x529   :  { %v2745_v23 = vsel %vm2489_vm3, %v5707_v53, %v2729_v57 }
 0x52a   :  { %v2762_v27 = vsel %vm2752_vm6, %v2745_v23, %v2652_v33 }
 0x52b   :  { %v2779_v0 = vsel %vm2769_vm7, %v2762_v27, %v2701_v52 }
 0x52c   :  { %2796 = vst.msk [vmem:[%s5915_s13 + $0x48] sm:$0xff] %vm2786_vm8, %v2779_v0 }
 0x52e   :  { %v2655_v20 = vpop.xlane.xlu1 %2654  ;;  %v2707_v47 = vpop.xlane.xlu0 %2706 }
 0x52f   :  { %v2730_v32 = vmin.f32 %v2655_v20, %v2704_v39  ;;  %v2731_v26 = vmin.f32 %v2658_v31, %v2707_v47 }
 0x530   :  { %v2667_v29 = vpop.xlane.xlu2 %2666 }
 0x531   :  { %v2746_v54 = vsel %vm2489_vm3, %v5715_v49, %v2730_v32  ;;  %v2747_v53 = vsel %vm2489_vm3, %v5730_v2, %v2731_v26 }
 0x532   :  { %v2763_v30 = vsel %vm2752_vm6, %v2746_v54, %v2655_v20  ;;  %v2764_v48 = vsel %vm2752_vm6, %v2747_v53, %v2658_v31 }
 0x533   :  { %v2780_v4 = vsel %vm2769_vm7, %v2763_v30, %v2704_v39  ;;  %v2781_v25 = vsel %vm2769_vm7, %v2764_v48, %v2707_v47 }
 0x534   :  { %2797 = vst.msk [vmem:[%s5915_s13 + $0x50] sm:$0xff] %vm2786_vm8, %v2780_v4 }
 0x535   :  { %2798 = vst.msk [vmem:[%s5915_s13 + $0x58] sm:$0xff] %vm2786_vm8, %v2781_v25 }
 0x536   :  { %v2710_v49 = vpop.xlane.xlu1 %2709  ;;  %v2661_v2 = vpop.xlane.xlu0 %2660 }
 0x537   :  { %v2732_v55 = vmin.f32 %v2661_v2, %v2710_v49 }
 0x538   :  { %v2713_v15 = vpop.xlane.xlu2 %2712 }
 0x539   :  { %v2748_v16 = vsel %vm2489_vm3, %v5742_v24, %v2732_v55 }
 0x53a   :  { %v2765_v28 = vsel %vm2752_vm6, %v2748_v16, %v2661_v2 }
 0x53b   :  { %v2782_v3 = vsel %vm2769_vm7, %v2765_v28, %v2710_v49 }
 0x53c   :  { %2799 = vst.msk [vmem:[%s5915_s13 + $0x60] sm:$0xff] %vm2786_vm8, %v2782_v3 }
 0x53e   :  { %v2664_v43 = vpop.xlane.xlu1 %2663  ;;  %v2670_v13 = vpop.xlane.xlu0 %2669 }
 0x53f   :  { %v2733_v11 = vmin.f32 %v2664_v43, %v2713_v15 }
 0x541   :  { %v2749_v5 = vsel %vm2489_vm3, %v5750_v22, %v2733_v11 }
 0x542   :  { %v2766_v42 = vsel %vm2752_vm6, %v2749_v5, %v2664_v43 }
 0x543   :  { %v2783_v24 = vsel %vm2769_vm7, %v2766_v42, %v2713_v15 }
 0x544   :  { %2800 = vst.msk [vmem:[%s5915_s13 + $0x68] sm:$0xff] %vm2786_vm8, %v2783_v24 }
 0x546   :  { %v2719_v41 = vpop.xlane.xlu1 %2718  ;;  %v2716_v56 = vpop.xlane.xlu0 %2715 }
 0x547   :  { %v2735_v1 = vmin.f32 %v2670_v13, %v2719_v41  ;;  %v2734_v38 = vmin.f32 %v2667_v29, %v2716_v56 }
 0x549   :  { %v2751_v6 = vsel %vm2489_vm3, %v5772_v46, %v2735_v1  ;;  %v2750_v37 = vsel %vm2489_vm3, %v5758_v59, %v2734_v38 }
 0x54a   :  { %v2768_v22 = vsel %vm2752_vm6, %v2751_v6, %v2670_v13  ;;  %v2767_v58 = vsel %vm2752_vm6, %v2750_v37, %v2667_v29 }
 0x54b   :  { %v2785_v7 = vsel %vm2769_vm7, %v2768_v22, %v2719_v41  ;;  %v2784_v63 = vsel %vm2769_vm7, %v2767_v58, %v2716_v56 }
 0x54c   :  { %2802 = vst.msk [vmem:[%s5915_s13 + $0x78] sm:$0xff] %vm2786_vm8, %v2785_v7 }
 0x54d   :  { %2801 = vst.msk [vmem:[%s5915_s13 + $0x70] sm:$0xff] %vm2786_vm8, %v2784_v63 }

</bundles_post_ra>
